<compile_context>
chip_gen: v6e
topology: v6e:2x2x1
jax: 0.10.0
libtpu: 0.0.40
codegen_flags: <defaults>
</compile_context>

<pallas_src>
import functools

import jax
import jax.numpy as jnp
from jax import lax
from jax.experimental import pallas as pl
from jax.experimental.pallas import tpu as pltpu

_BF16 = jnp.bfloat16
_F32 = jnp.float32
# Tap order matches the (kh, kw)-row-major weight layout: (dh, dw) = (kh-1, kw-1).
_TAPS = [(dh, dw) for dh in (-1, 0, 1) for dw in (-1, 0, 1)]


# ------------------------------ Pallas kernel ------------------------------- #

def _fused_model_kernel(Ho, Wo, has_u0, *refs):
    """Whole DilatedConvModel forward for one batch element (one grid step)."""
    if has_u0:
        (p0_ref, p4_ref, p6_ref,
         w1_ref, b1_ref, u0_ref,
         w23_ref, b23_ref, u4_ref,
         w4_ref, b4_ref, u6_ref,
         mhlo_ref, mhhi_ref, mwlo_ref, mwhi_ref,
         wf1_ref, bf1_ref, wf2_ref, bf2_ref,
         wf3_ref, bf3_ref, o_ref) = refs
    else:
        (p0_ref, p4_ref, p6_ref,
         w1_ref, b1_ref,
         w23_ref, b23_ref, u4_ref,
         w4_ref, b4_ref, u6_ref,
         mhlo_ref, mhhi_ref, mwlo_ref, mwhi_ref,
         wf1_ref, bf1_ref, wf2_ref, bf2_ref,
         wf3_ref, bf3_ref, o_ref) = refs
        u0_ref = None

    M = Ho * Wo

    def conv_bias_relu(w_ref, patches, b_ref):
        y = jnp.dot(w_ref[...], patches, preferred_element_type=_F32) + b_ref[...]
        return jnp.maximum(y, 0.0)

    # ---- ASPP branches: conv + BN(folded) + ReLU (+ bilinear upsample). ----
    y1 = conv_bias_relu(w1_ref, p0_ref[0], b1_ref)               # (Co, H*W)
    if u0_ref is not None:                                       # identity skip at `size`
        y1 = jnp.dot(y1.astype(_BF16), u0_ref[...], preferred_element_type=_F32)
    y23 = conv_bias_relu(w23_ref, p4_ref[0], b23_ref)            # (2Co, H4*W4)
    y23 = jnp.dot(y23.astype(_BF16), u4_ref[...], preferred_element_type=_F32)
    y4 = conv_bias_relu(w4_ref, p6_ref[0], b4_ref)               # (Co, H6*W6)
    y4 = jnp.dot(y4.astype(_BF16), u6_ref[...], preferred_element_type=_F32)
    xc = jnp.concatenate([y1, y23, y4], axis=0)                  # (4Co, M) f32

    # Boundary masks (precomputed in the wrapper; each is (1, M) f32).
    hmask = {-1: mhlo_ref[...], 0: None, 1: mhhi_ref[...]}
    wmask = {-1: mwlo_ref[...], 0: None, 1: mwhi_ref[...]}

    def shift_lanes(x, off):
        # out[:, i] = x[:, i + off], zero-filled where i + off falls outside [0, M).
        if off == 0:
            return x
        fill = jnp.zeros((x.shape[0], abs(off)), x.dtype)
        if off > 0:
            return jnp.concatenate([x[:, off:], fill], axis=1)
        return jnp.concatenate([fill, x[:, :off]], axis=1)

    def conv3x3_bias_relu(x, wt_ref, b_ref):
        # x: (Cin, M) f32; wt_ref: (9*Cout, Cin) bf16, rows grouped per tap.
        co = wt_ref.shape[0] // 9
        acc = jnp.zeros((co, M), _F32)
        for t, (dh, dw) in enumerate(_TAPS):
            xs = shift_lanes(x, dh * Wo + dw)
            if hmask[dh] is not None:
                xs = xs * hmask[dh]
            if wmask[dw] is not None:
                xs = xs * wmask[dw]
            acc = acc + jnp.dot(wt_ref[t * co:(t + 1) * co, :], xs.astype(_BF16),
                                preferred_element_type=_F32)
        return jnp.maximum(acc + b_ref[...], 0.0)

    # ---- conv_final: 3x3 -> BN -> ReLU -> 3x3 -> BN -> ReLU -> 1x1 (+bias). -
    y = conv3x3_bias_relu(xc, wf1_ref, bf1_ref)                  # (2Co, M)
    y = conv3x3_bias_relu(y, wf2_ref, bf2_ref)                   # (Co, M)
    y = jnp.dot(wf3_ref[...], y.astype(_BF16),
                preferred_element_type=_F32) + bf3_ref[...]      # final 1x1 conv
    o_ref[0] = y.astype(o_ref.dtype)


# ------------------------------ call wrapper -------------------------------- #

def fused_forward_call(Ho, Wo, p0, p4, p6, w1, b1, u0, w23, b23, u4,
                       w4, b4, u6, masks, wf1t, bf1, wf2t, bf2, wf3, bf3):
    N = p0.shape[0]
    M = Ho * Wo
    Co = w1.shape[0]

    def batch_spec(a):
        nd = a.ndim
        return pl.BlockSpec((1,) + a.shape[1:], lambda n: (n,) + (0,) * (nd - 1))

    def const_spec(a):
        nd = a.ndim
        return pl.BlockSpec(a.shape, lambda n: (0,) * nd)

    def as_bf16(a):
        return a.astype(_BF16)

    def as_col(b):
        return b.reshape(-1, 1).astype(_F32)

    args, specs = [], []

    def add(a, spec_fn):
        args.append(a)
        specs.append(spec_fn(a))

    add(as_bf16(p0), batch_spec)
    add(as_bf16(p4), batch_spec)
    add(as_bf16(p6), batch_spec)
    add(as_bf16(w1), const_spec)
    add(as_col(b1), const_spec)
    if u0 is not None:
        add(as_bf16(u0), const_spec)
    add(as_bf16(w23), const_spec)
    add(as_col(b23), const_spec)
    add(as_bf16(u4), const_spec)
    add(as_bf16(w4), const_spec)
    add(as_col(b4), const_spec)
    add(as_bf16(u6), const_spec)
    for m in masks:                       # 4 x (1, M) f32 boundary masks
        add(m, const_spec)
    add(as_bf16(wf1t), const_spec)
    add(as_col(bf1), const_spec)
    add(as_bf16(wf2t), const_spec)
    add(as_col(bf2), const_spec)
    add(as_bf16(wf3), const_spec)
    add(as_col(bf3), const_spec)

    kernel = functools.partial(_fused_model_kernel, Ho, Wo, u0 is not None)
    return pl.pallas_call(
        kernel,
        out_shape=jax.ShapeDtypeStruct((N, Co, M), _F32),
        grid=(N,),
        in_specs=specs,
        out_specs=pl.BlockSpec((1, Co, M), lambda n: (n, 0, 0)),
        compiler_params=pltpu.CompilerParams(dimension_semantics=("parallel",)),
    )(*args)


# ------------------------------ JAX glue ------------------------------------ #

def im2col_batched(x, K, dilation, padding):
    """x: (N, C, H, W) -> (N, K*K*C, Hout*Wout); rows ordered (kh, kw, c)."""
    N, C, H, W = x.shape
    xp = jnp.pad(x, ((0, 0), (0, 0), (padding, padding), (padding, padding)))
    Hout = H + 2 * padding - dilation * (K - 1)
    Wout = W + 2 * padding - dilation * (K - 1)
    cols = [xp[:, :, kh * dilation: kh * dilation + Hout,
               kw * dilation: kw * dilation + Wout]
            for kh in range(K) for kw in range(K)]
    p = jnp.stack(cols, axis=1)                        # (N, K*K, C, Hout, Wout)
    return p.reshape(N, K * K * C, Hout * Wout), Hout, Wout


def bilinear_matrix(in_size, out_size):
    """1-D bilinear interpolation matrix (out, in); PyTorch align_corners=False."""
    scale = in_size / out_size
    i = jnp.arange(out_size, dtype=jnp.float32)
    src = jnp.maximum((i + 0.5) * scale - 0.5, 0.0)
    i0 = jnp.minimum(jnp.floor(src).astype(jnp.int32), in_size - 1)
    i1 = jnp.minimum(i0 + 1, in_size - 1)
    lam = src - i0.astype(jnp.float32)
    B = jnp.zeros((out_size, in_size), jnp.float32)
    B = B.at[jnp.arange(out_size), i0].add(1.0 - lam)
    B = B.at[jnp.arange(out_size), i1].add(lam)
    return B


def upsample_rhs(Hi, Wi, Ho, Wo):
    """(Hi*Wi, Ho*Wo) right-multiply bilinear upsample operator (shared over batch)."""
    return jnp.kron(bilinear_matrix(Hi, Ho), bilinear_matrix(Wi, Wo)).T


def boundary_masks(Ho, Wo):
    """Four (1, Ho*Wo) f32 masks: valid-row/col indicators for the 3x3 tap shifts."""
    hpos, wpos = jnp.divmod(jnp.arange(Ho * Wo, dtype=jnp.int32), Wo)
    row = lambda m: m.astype(_F32).reshape(1, Ho * Wo)
    return (row(hpos >= 1), row(hpos <= Ho - 2), row(wpos >= 1), row(wpos <= Wo - 2))


def bn_fold(w, bn, eps=1e-5):
    """Fold eval-mode BatchNorm into the conv: returns (w_folded, bias)."""
    gamma, beta, mean, var = bn
    s = gamma * lax.rsqrt(var + eps)
    return w * s[:, None, None, None], beta - mean * s


def tap_major(w):
    """(Cout, 3, 3, Cin) -> (9*Cout, Cin); rows grouped by tap t = kh*3 + kw."""
    co, kh, kw, ci = w.shape
    return jnp.transpose(w, (1, 2, 0, 3)).reshape(kh * kw * co, ci)


def forward(x_nchw, params, size=(16, 16), atrous_rates=(2, 4, 6)):
    N, Cin, H, W = x_nchw.shape
    Ho, Wo = size
    Co = params["w1"].shape[0]
    x = x_nchw.astype(_BF16)

    # ASPP branch weights (BN folded) and per-batch patch tensors.
    w1, b1 = bn_fold(params["w1"], params["bn1"])
    w2, b2 = bn_fold(params["w2"], params["bn2"])
    w3, b3 = bn_fold(params["w3"], params["bn3"])
    w4, b4 = bn_fold(params["w4"], params["bn4"])

    p0 = x.reshape(N, Cin, H * W)                                 # 1x1-conv "patches"
    u0 = None if (H, W) == (Ho, Wo) else upsample_rhs(H, W, Ho, Wo)

    # Branches 2 & 3 share dilation = atrous_rates[1] (as in the PyTorch module;
    # atrous_rates[0] is unused there): one im2col, weights fused along Cout.
    p4, H4, W4 = im2col_batched(x, 3, atrous_rates[1], 1)
    p6, H6, W6 = im2col_batched(x, 3, atrous_rates[2], 1)
    w23 = jnp.concatenate([w2.reshape(Co, -1), w3.reshape(Co, -1)], axis=0)
    b23 = jnp.concatenate([b2, b3], axis=0)
    u4 = upsample_rhs(H4, W4, Ho, Wo)
    u6 = upsample_rhs(H6, W6, Ho, Wo)

    # conv_final weights: BN folded, re-laid out tap-major for 9-tap accumulation.
    wf1, bf1 = bn_fold(params["wf1"], params["bnf1"])
    wf2, bf2 = bn_fold(params["wf2"], params["bnf2"])

    out = fused_forward_call(
        Ho, Wo, p0, p4, p6,
        w1.reshape(Co, Cin), b1, u0,
        w23, b23, u4,
        w4.reshape(Co, -1), b4, u6,
        boundary_masks(Ho, Wo),
        tap_major(wf1), bf1, tap_major(wf2), bf2,
        params["wf3"].reshape(Co, Co), params["bf3"])
    return out.reshape(N, Co, Ho, Wo)                             # NCHW


# --------------------- pure-JAX float32 reference (for checking) ------------ #

def reference_forward(x, params, size=(16, 16), atrous_rates=(2, 4, 6)):
    Ho, Wo = size
    dn = ("NCHW", "OHWI", "NCHW")          # weights stored (Cout, Kh, Kw, Cin)
    hp = lax.Precision.HIGHEST

    def conv(inp, w, dilation, padding):
        return lax.conv_general_dilated(
            inp, w, window_strides=(1, 1),
            padding=((padding, padding), (padding, padding)),
            rhs_dilation=(dilation, dilation),
            dimension_numbers=dn, precision=hp)

    def upsample(y):
        Bh = bilinear_matrix(y.shape[2], Ho)
        Bw = bilinear_matrix(y.shape[3], Wo)
        return jnp.einsum("nchw,Hh,Ww->ncHW", y, Bh, Bw, precision=hp)

    def branch(w_key, bn_key, dilation, padding):
        w, b = bn_fold(params[w_key], params[bn_key])
        y = jnp.maximum(conv(x, w, dilation, padding) + b[None, :, None, None], 0.0)
        return upsample(y)

    r = atrous_rates
    xc = jnp.concatenate([branch("w1", "bn1", 1, 0),
                          branch("w2", "bn2", r[1], 1),
                          branch("w3", "bn3", r[1], 1),
                          branch("w4", "bn4", r[2], 1)], axis=1)

    wf1, bf1 = bn_fold(params["wf1"], params["bnf1"])
    wf2, bf2 = bn_fold(params["wf2"], params["bnf2"])
    y = jnp.maximum(conv(xc, wf1, 1, 1) + bf1[None, :, None, None], 0.0)
    y = jnp.maximum(conv(y, wf2, 1, 1) + bf2[None, :, None, None], 0.0)
    return conv(y, params["wf3"], 1, 0) + params["bf3"][None, :, None, None]


# ------------------------------ params & main -------------------------------- #

def init_params(key, cin, cout):
    ks = jax.random.split(key, 14)

    def conv_w(k, K, ci, co):
        # (Cout, Kh, Kw, Cin) layout (PyTorch (Cout, Cin, Kh, Kw) checkpoints
        # would need .transpose(0, 2, 3, 1)).
        return 0.1 * jax.random.normal(k, (co, K, K, ci), jnp.float32)

    def bn(k, c):
        k1, k2, k3, k4 = jax.random.split(k, 4)
        return (1.0 + 0.1 * jax.random.normal(k1, (c,), jnp.float32),    # gamma
                0.1 * jax.random.normal(k2, (c,), jnp.float32),          # beta
                0.1 * jax.random.normal(k3, (c,), jnp.float32),          # running_mean
                1.0 + 0.1 * jax.random.uniform(k4, (c,), jnp.float32))   # running_var

    return dict(
        w1=conv_w(ks[0], 1, cin, cout), bn1=bn(ks[1], cout),
        w2=conv_w(ks[2], 3, cin, cout), bn2=bn(ks[3], cout),
        w3=conv_w(ks[4], 3, cin, cout), bn3=bn(ks[5], cout),
        w4=conv_w(ks[6], 3, cin, cout), bn4=bn(ks[7], cout),
        wf1=conv_w(ks[8], 3, 4 * cout, 2 * cout), bnf1=bn(ks[9], 2 * cout),
        wf2=conv_w(ks[10], 3, 2 * cout, cout), bnf2=bn(ks[11], cout),
        wf3=conv_w(ks[12], 1, cout, cout),
        bf3=0.1 * jax.random.normal(ks[13], (cout,), jnp.float32),
    )


if __name__ == "__main__":
    key = jax.random.PRNGKey(0)
    kx, kp = jax.random.split(key)
    inchannel, outchannel = 4, 8
    x = jax.random.normal(kx, (2, inchannel, 16, 16), jnp.float32)   # NCHW input
    params = init_params(kp, inchannel, outchannel)

    fwd = jax.jit(functools.partial(forward, size=(16, 16), atrous_rates=(2, 4, 6)))
    out = jax.block_until_ready(fwd(x, params))

    assert out.shape == (2, outchannel, 16, 16), out.shape
    assert bool(jnp.all(jnp.isfinite(out)))

    # Loose check against a pure-JAX float32 reference (the kernel uses bf16 MXU
    # operands, so exact match is not expected; structural errors would be >> 0.08).
    ref = jax.block_until_ready(jax.jit(reference_forward)(x, params))
    max_err = float(jnp.max(jnp.abs(out - ref)))
    assert max_err < 0.08, f"max abs err vs reference: {max_err}"
    print("KERNEL_OK")
</pallas_src>

<mosaic_0001>
module attributes {stable_mosaic.version = 11 : i64} {
  func.func private @main(%arg0: i32) attributes {dimension_semantics = [#tpu.dimension_semantics<core_parallel>], iteration_bounds = array<i64: 2>, tpu.core_type = #tpu.core_type<sc_scalar_subcore>, window_params = []} {
    return
  }
}

module attributes {stable_mosaic.version = 11 : i64} {
  func.func private @main(%arg0: i32) attributes {dimension_semantics = [#tpu.dimension_semantics<core_parallel>], iteration_bounds = array<i64: 2>, tpu.core_type = #tpu.core_type<sc_scalar_subcore>, window_params = []} {
    return
  }
}

module attributes {stable_mosaic.version = 11 : i64} {
  func.func @_fused_model_kernel(%arg0: i32, %arg1: memref<1x4x256xbf16, #tpu.memory_space<vmem>>, %arg2: memref<1x36x100xbf16, #tpu.memory_space<vmem>>, %arg3: memref<1x36x36xbf16, #tpu.memory_space<vmem>>, %arg4: memref<8x4xbf16, #tpu.memory_space<vmem>>, %arg5: memref<8x1xf32, #tpu.memory_space<vmem>>, %arg6: memref<16x36xbf16, #tpu.memory_space<vmem>>, %arg7: memref<16x1xf32, #tpu.memory_space<vmem>>, %arg8: memref<100x256xbf16, #tpu.memory_space<vmem>>, %arg9: memref<8x36xbf16, #tpu.memory_space<vmem>>, %arg10: memref<8x1xf32, #tpu.memory_space<vmem>>, %arg11: memref<36x256xbf16, #tpu.memory_space<vmem>>, %arg12: memref<1x256xf32, #tpu.memory_space<vmem>>, %arg13: memref<1x256xf32, #tpu.memory_space<vmem>>, %arg14: memref<1x256xf32, #tpu.memory_space<vmem>>, %arg15: memref<1x256xf32, #tpu.memory_space<vmem>>, %arg16: memref<144x32xbf16, #tpu.memory_space<vmem>>, %arg17: memref<16x1xf32, #tpu.memory_space<vmem>>, %arg18: memref<72x16xbf16, #tpu.memory_space<vmem>>, %arg19: memref<8x1xf32, #tpu.memory_space<vmem>>, %arg20: memref<8x8xbf16, #tpu.memory_space<vmem>>, %arg21: memref<8x1xf32, #tpu.memory_space<vmem>>, %arg22: memref<1x8x256xf32, #tpu.memory_space<vmem>>) attributes {dimension_semantics = [#tpu.dimension_semantics<parallel>], iteration_bounds = array<i64: 2>, scalar_prefetch = 0 : i64, scratch_operands = 0 : i64, tpu.core_type = #tpu.core_type<tc>, window_params = [{transform_indices = @transform_0, window_bounds = array<i64: 1, 4, 256>}, {transform_indices = @transform_1, window_bounds = array<i64: 1, 36, 100>}, {transform_indices = @transform_2, window_bounds = array<i64: 1, 36, 36>}, {pipeline_mode = #tpu.pipeline_mode<synchronous>, transform_indices = @transform_3, window_bounds = array<i64: 8, 4>}, {pipeline_mode = #tpu.pipeline_mode<synchronous>, transform_indices = @transform_4, window_bounds = array<i64: 8, 1>}, {pipeline_mode = #tpu.pipeline_mode<synchronous>, transform_indices = @transform_5, window_bounds = array<i64: 16, 36>}, {pipeline_mode = #tpu.pipeline_mode<synchronous>, transform_indices = @transform_6, window_bounds = array<i64: 16, 1>}, {pipeline_mode = #tpu.pipeline_mode<synchronous>, transform_indices = @transform_7, window_bounds = array<i64: 100, 256>}, {pipeline_mode = #tpu.pipeline_mode<synchronous>, transform_indices = @transform_8, window_bounds = array<i64: 8, 36>}, {pipeline_mode = #tpu.pipeline_mode<synchronous>, transform_indices = @transform_9, window_bounds = array<i64: 8, 1>}, {pipeline_mode = #tpu.pipeline_mode<synchronous>, transform_indices = @transform_10, window_bounds = array<i64: 36, 256>}, {pipeline_mode = #tpu.pipeline_mode<synchronous>, transform_indices = @transform_11, window_bounds = array<i64: 1, 256>}, {pipeline_mode = #tpu.pipeline_mode<synchronous>, transform_indices = @transform_12, window_bounds = array<i64: 1, 256>}, {pipeline_mode = #tpu.pipeline_mode<synchronous>, transform_indices = @transform_13, window_bounds = array<i64: 1, 256>}, {pipeline_mode = #tpu.pipeline_mode<synchronous>, transform_indices = @transform_14, window_bounds = array<i64: 1, 256>}, {pipeline_mode = #tpu.pipeline_mode<synchronous>, transform_indices = @transform_15, window_bounds = array<i64: 144, 32>}, {pipeline_mode = #tpu.pipeline_mode<synchronous>, transform_indices = @transform_16, window_bounds = array<i64: 16, 1>}, {pipeline_mode = #tpu.pipeline_mode<synchronous>, transform_indices = @transform_17, window_bounds = array<i64: 72, 16>}, {pipeline_mode = #tpu.pipeline_mode<synchronous>, transform_indices = @transform_18, window_bounds = array<i64: 8, 1>}, {pipeline_mode = #tpu.pipeline_mode<synchronous>, transform_indices = @transform_19, window_bounds = array<i64: 8, 8>}, {pipeline_mode = #tpu.pipeline_mode<synchronous>, transform_indices = @transform_20, window_bounds = array<i64: 8, 1>}, {transform_indices = @transform_21, window_bounds = array<i64: 1, 8, 256>}]} {
    %c0 = arith.constant 0 : index
    %c0_0 = arith.constant 0 : index
    %c0_1 = arith.constant 0 : index
    %0 = vector.load %arg1[%c0, %c0_0, %c0_1] : memref<1x4x256xbf16, #tpu.memory_space<vmem>>, vector<1x4x256xbf16>
    %1 = vector.shape_cast %0 : vector<1x4x256xbf16> to vector<4x256xbf16>
    %c0_2 = arith.constant 0 : index
    %c0_3 = arith.constant 0 : index
    %2 = vector.load %arg4[%c0_2, %c0_3] : memref<8x4xbf16, #tpu.memory_space<vmem>>, vector<8x4xbf16>
    %cst = arith.constant dense<0.000000e+00> : vector<8x256xf32>
    %3 = tpu.matmul %2, %1, %cst {dimension_numbers = #tpu.dot_dimension_numbers<[1], [0], [0], [1], [0, 0, 1, 1], [], []>} : vector<8x4xbf16>, vector<4x256xbf16>, vector<8x256xf32> -> vector<8x256xf32>
    %c0_4 = arith.constant 0 : index
    %c0_5 = arith.constant 0 : index
    %4 = vector.load %arg5[%c0_4, %c0_5] : memref<8x1xf32, #tpu.memory_space<vmem>>, vector<8x1xf32>
    %5 = vector.broadcast %4 : vector<8x1xf32> to vector<8x256xf32>
    %6 = arith.addf %3, %5 : vector<8x256xf32>
    %cst_6 = arith.constant 0.000000e+00 : f32
    %7 = vector.broadcast %cst_6 : f32 to vector<8x256xf32>
    %8 = arith.maximumf %6, %7 : vector<8x256xf32>
    %c0_7 = arith.constant 0 : index
    %c0_8 = arith.constant 0 : index
    %c0_9 = arith.constant 0 : index
    %9 = vector.load %arg2[%c0_7, %c0_8, %c0_9] : memref<1x36x100xbf16, #tpu.memory_space<vmem>>, vector<1x36x100xbf16>
    %10 = vector.shape_cast %9 : vector<1x36x100xbf16> to vector<36x100xbf16>
    %c0_10 = arith.constant 0 : index
    %c0_11 = arith.constant 0 : index
    %11 = vector.load %arg6[%c0_10, %c0_11] : memref<16x36xbf16, #tpu.memory_space<vmem>>, vector<16x36xbf16>
    %cst_12 = arith.constant dense<0.000000e+00> : vector<16x100xf32>
    %12 = tpu.matmul %11, %10, %cst_12 {dimension_numbers = #tpu.dot_dimension_numbers<[1], [0], [0], [1], [0, 0, 1, 1], [], []>} : vector<16x36xbf16>, vector<36x100xbf16>, vector<16x100xf32> -> vector<16x100xf32>
    %c0_13 = arith.constant 0 : index
    %c0_14 = arith.constant 0 : index
    %13 = vector.load %arg7[%c0_13, %c0_14] : memref<16x1xf32, #tpu.memory_space<vmem>>, vector<16x1xf32>
    %14 = vector.broadcast %13 : vector<16x1xf32> to vector<16x100xf32>
    %15 = arith.addf %12, %14 : vector<16x100xf32>
    %cst_15 = arith.constant 0.000000e+00 : f32
    %16 = vector.broadcast %cst_15 : f32 to vector<16x100xf32>
    %17 = arith.maximumf %15, %16 : vector<16x100xf32>
    %18 = arith.truncf %17 : vector<16x100xf32> to vector<16x100xbf16>
    %c0_16 = arith.constant 0 : index
    %c0_17 = arith.constant 0 : index
    %19 = vector.load %arg8[%c0_16, %c0_17] : memref<100x256xbf16, #tpu.memory_space<vmem>>, vector<100x256xbf16>
    %cst_18 = arith.constant dense<0.000000e+00> : vector<16x256xf32>
    %20 = tpu.matmul %18, %19, %cst_18 {dimension_numbers = #tpu.dot_dimension_numbers<[1], [0], [0], [1], [0, 0, 1, 1], [], []>} : vector<16x100xbf16>, vector<100x256xbf16>, vector<16x256xf32> -> vector<16x256xf32>
    %c0_19 = arith.constant 0 : index
    %c0_20 = arith.constant 0 : index
    %c0_21 = arith.constant 0 : index
    %21 = vector.load %arg3[%c0_19, %c0_20, %c0_21] : memref<1x36x36xbf16, #tpu.memory_space<vmem>>, vector<1x36x36xbf16>
    %22 = vector.shape_cast %21 : vector<1x36x36xbf16> to vector<36x36xbf16>
    %c0_22 = arith.constant 0 : index
    %c0_23 = arith.constant 0 : index
    %23 = vector.load %arg9[%c0_22, %c0_23] : memref<8x36xbf16, #tpu.memory_space<vmem>>, vector<8x36xbf16>
    %cst_24 = arith.constant dense<0.000000e+00> : vector<8x36xf32>
    %24 = tpu.matmul %23, %22, %cst_24 {dimension_numbers = #tpu.dot_dimension_numbers<[1], [0], [0], [1], [0, 0, 1, 1], [], []>} : vector<8x36xbf16>, vector<36x36xbf16>, vector<8x36xf32> -> vector<8x36xf32>
    %c0_25 = arith.constant 0 : index
    %c0_26 = arith.constant 0 : index
    %25 = vector.load %arg10[%c0_25, %c0_26] : memref<8x1xf32, #tpu.memory_space<vmem>>, vector<8x1xf32>
    %26 = vector.broadcast %25 : vector<8x1xf32> to vector<8x36xf32>
    %27 = arith.addf %24, %26 : vector<8x36xf32>
    %cst_27 = arith.constant 0.000000e+00 : f32
    %28 = vector.broadcast %cst_27 : f32 to vector<8x36xf32>
    %29 = arith.maximumf %27, %28 : vector<8x36xf32>
    %30 = arith.truncf %29 : vector<8x36xf32> to vector<8x36xbf16>
    %c0_28 = arith.constant 0 : index
    %c0_29 = arith.constant 0 : index
    %31 = vector.load %arg11[%c0_28, %c0_29] : memref<36x256xbf16, #tpu.memory_space<vmem>>, vector<36x256xbf16>
    %cst_30 = arith.constant dense<0.000000e+00> : vector<8x256xf32>
    %32 = tpu.matmul %30, %31, %cst_30 {dimension_numbers = #tpu.dot_dimension_numbers<[1], [0], [0], [1], [0, 0, 1, 1], [], []>} : vector<8x36xbf16>, vector<36x256xbf16>, vector<8x256xf32> -> vector<8x256xf32>
    %33 = tpu.concatenate %8, %20, %32 in 0 : vector<8x256xf32>, vector<16x256xf32>, vector<8x256xf32> -> vector<32x256xf32>
    %c0_31 = arith.constant 0 : index
    %c0_32 = arith.constant 0 : index
    %34 = vector.load %arg12[%c0_31, %c0_32] : memref<1x256xf32, #tpu.memory_space<vmem>>, vector<1x256xf32>
    %c0_33 = arith.constant 0 : index
    %c0_34 = arith.constant 0 : index
    %35 = vector.load %arg13[%c0_33, %c0_34] : memref<1x256xf32, #tpu.memory_space<vmem>>, vector<1x256xf32>
    %c0_35 = arith.constant 0 : index
    %c0_36 = arith.constant 0 : index
    %36 = vector.load %arg14[%c0_35, %c0_36] : memref<1x256xf32, #tpu.memory_space<vmem>>, vector<1x256xf32>
    %c0_37 = arith.constant 0 : index
    %c0_38 = arith.constant 0 : index
    %37 = vector.load %arg15[%c0_37, %c0_38] : memref<1x256xf32, #tpu.memory_space<vmem>>, vector<1x256xf32>
    %cst_39 = arith.constant 0.000000e+00 : f32
    %38 = vector.broadcast %cst_39 : f32 to vector<16x256xf32>
    %cst_40 = arith.constant 0.000000e+00 : f32
    %39 = vector.broadcast %cst_40 : f32 to vector<32x17xf32>
    %40 = vector.extract_strided_slice %33 {offsets = [0, 0], sizes = [32, 239], strides = [1, 1]} : vector<32x256xf32> to vector<32x239xf32>
    %41 = tpu.concatenate %39, %40 in 1 : vector<32x17xf32>, vector<32x239xf32> -> vector<32x256xf32>
    %42 = vector.broadcast %34 : vector<1x256xf32> to vector<32x256xf32>
    %43 = arith.mulf %41, %42 : vector<32x256xf32>
    %44 = vector.broadcast %36 : vector<1x256xf32> to vector<32x256xf32>
    %45 = arith.mulf %43, %44 : vector<32x256xf32>
    %c0_41 = arith.constant 0 : index
    %c0_42 = arith.constant 0 : index
    %46 = vector.load %arg16[%c0_41, %c0_42] : memref<144x32xbf16, #tpu.memory_space<vmem>>, vector<16x32xbf16>
    %47 = arith.truncf %45 : vector<32x256xf32> to vector<32x256xbf16>
    %cst_43 = arith.constant dense<0.000000e+00> : vector<16x256xf32>
    %48 = tpu.matmul %46, %47, %cst_43 {dimension_numbers = #tpu.dot_dimension_numbers<[1], [0], [0], [1], [0, 0, 1, 1], [], []>} : vector<16x32xbf16>, vector<32x256xbf16>, vector<16x256xf32> -> vector<16x256xf32>
    %49 = arith.addf %38, %48 : vector<16x256xf32>
    %cst_44 = arith.constant 0.000000e+00 : f32
    %50 = vector.broadcast %cst_44 : f32 to vector<32x16xf32>
    %51 = vector.extract_strided_slice %33 {offsets = [0, 0], sizes = [32, 240], strides = [1, 1]} : vector<32x256xf32> to vector<32x240xf32>
    %52 = tpu.concatenate %50, %51 in 1 : vector<32x16xf32>, vector<32x240xf32> -> vector<32x256xf32>
    %53 = vector.broadcast %34 : vector<1x256xf32> to vector<32x256xf32>
    %54 = arith.mulf %52, %53 : vector<32x256xf32>
    %c16 = arith.constant 16 : index
    %c0_45 = arith.constant 0 : index
    %55 = vector.load %arg16[%c16, %c0_45] : memref<144x32xbf16, #tpu.memory_space<vmem>>, vector<16x32xbf16>
    %56 = arith.truncf %54 : vector<32x256xf32> to vector<32x256xbf16>
    %cst_46 = arith.constant dense<0.000000e+00> : vector<16x256xf32>
    %57 = tpu.matmul %55, %56, %cst_46 {dimension_numbers = #tpu.dot_dimension_numbers<[1], [0], [0], [1], [0, 0, 1, 1], [], []>} : vector<16x32xbf16>, vector<32x256xbf16>, vector<16x256xf32> -> vector<16x256xf32>
    %58 = arith.addf %49, %57 : vector<16x256xf32>
    %cst_47 = arith.constant 0.000000e+00 : f32
    %59 = vector.broadcast %cst_47 : f32 to vector<32x15xf32>
    %60 = vector.extract_strided_slice %33 {offsets = [0, 0], sizes = [32, 241], strides = [1, 1]} : vector<32x256xf32> to vector<32x241xf32>
    %61 = tpu.concatenate %59, %60 in 1 : vector<32x15xf32>, vector<32x241xf32> -> vector<32x256xf32>
    %62 = vector.broadcast %34 : vector<1x256xf32> to vector<32x256xf32>
    %63 = arith.mulf %61, %62 : vector<32x256xf32>
    %64 = vector.broadcast %37 : vector<1x256xf32> to vector<32x256xf32>
    %65 = arith.mulf %63, %64 : vector<32x256xf32>
    %c32 = arith.constant 32 : index
    %c0_48 = arith.constant 0 : index
    %66 = vector.load %arg16[%c32, %c0_48] : memref<144x32xbf16, #tpu.memory_space<vmem>>, vector<16x32xbf16>
    %67 = arith.truncf %65 : vector<32x256xf32> to vector<32x256xbf16>
    %cst_49 = arith.constant dense<0.000000e+00> : vector<16x256xf32>
    %68 = tpu.matmul %66, %67, %cst_49 {dimension_numbers = #tpu.dot_dimension_numbers<[1], [0], [0], [1], [0, 0, 1, 1], [], []>} : vector<16x32xbf16>, vector<32x256xbf16>, vector<16x256xf32> -> vector<16x256xf32>
    %69 = arith.addf %58, %68 : vector<16x256xf32>
    %cst_50 = arith.constant 0.000000e+00 : f32
    %70 = vector.broadcast %cst_50 : f32 to vector<32x1xf32>
    %71 = vector.extract_strided_slice %33 {offsets = [0, 0], sizes = [32, 255], strides = [1, 1]} : vector<32x256xf32> to vector<32x255xf32>
    %72 = tpu.concatenate %70, %71 in 1 : vector<32x1xf32>, vector<32x255xf32> -> vector<32x256xf32>
    %73 = vector.broadcast %36 : vector<1x256xf32> to vector<32x256xf32>
    %74 = arith.mulf %72, %73 : vector<32x256xf32>
    %c48 = arith.constant 48 : index
    %c0_51 = arith.constant 0 : index
    %75 = vector.load %arg16[%c48, %c0_51] : memref<144x32xbf16, #tpu.memory_space<vmem>>, vector<16x32xbf16>
    %76 = arith.truncf %74 : vector<32x256xf32> to vector<32x256xbf16>
    %cst_52 = arith.constant dense<0.000000e+00> : vector<16x256xf32>
    %77 = tpu.matmul %75, %76, %cst_52 {dimension_numbers = #tpu.dot_dimension_numbers<[1], [0], [0], [1], [0, 0, 1, 1], [], []>} : vector<16x32xbf16>, vector<32x256xbf16>, vector<16x256xf32> -> vector<16x256xf32>
    %78 = arith.addf %69, %77 : vector<16x256xf32>
    %c64 = arith.constant 64 : index
    %c0_53 = arith.constant 0 : index
    %79 = vector.load %arg16[%c64, %c0_53] : memref<144x32xbf16, #tpu.memory_space<vmem>>, vector<16x32xbf16>
    %80 = arith.truncf %33 : vector<32x256xf32> to vector<32x256xbf16>
    %cst_54 = arith.constant dense<0.000000e+00> : vector<16x256xf32>
    %81 = tpu.matmul %79, %80, %cst_54 {dimension_numbers = #tpu.dot_dimension_numbers<[1], [0], [0], [1], [0, 0, 1, 1], [], []>} : vector<16x32xbf16>, vector<32x256xbf16>, vector<16x256xf32> -> vector<16x256xf32>
    %82 = arith.addf %78, %81 : vector<16x256xf32>
    %cst_55 = arith.constant 0.000000e+00 : f32
    %83 = vector.broadcast %cst_55 : f32 to vector<32x1xf32>
    %84 = vector.extract_strided_slice %33 {offsets = [0, 1], sizes = [32, 255], strides = [1, 1]} : vector<32x256xf32> to vector<32x255xf32>
    %85 = tpu.concatenate %84, %83 in 1 : vector<32x255xf32>, vector<32x1xf32> -> vector<32x256xf32>
    %86 = vector.broadcast %37 : vector<1x256xf32> to vector<32x256xf32>
    %87 = arith.mulf %85, %86 : vector<32x256xf32>
    %c80 = arith.constant 80 : index
    %c0_56 = arith.constant 0 : index
    %88 = vector.load %arg16[%c80, %c0_56] : memref<144x32xbf16, #tpu.memory_space<vmem>>, vector<16x32xbf16>
    %89 = arith.truncf %87 : vector<32x256xf32> to vector<32x256xbf16>
    %cst_57 = arith.constant dense<0.000000e+00> : vector<16x256xf32>
    %90 = tpu.matmul %88, %89, %cst_57 {dimension_numbers = #tpu.dot_dimension_numbers<[1], [0], [0], [1], [0, 0, 1, 1], [], []>} : vector<16x32xbf16>, vector<32x256xbf16>, vector<16x256xf32> -> vector<16x256xf32>
    %91 = arith.addf %82, %90 : vector<16x256xf32>
    %cst_58 = arith.constant 0.000000e+00 : f32
    %92 = vector.broadcast %cst_58 : f32 to vector<32x15xf32>
    %93 = vector.extract_strided_slice %33 {offsets = [0, 15], sizes = [32, 241], strides = [1, 1]} : vector<32x256xf32> to vector<32x241xf32>
    %94 = tpu.concatenate %93, %92 in 1 : vector<32x241xf32>, vector<32x15xf32> -> vector<32x256xf32>
    %95 = vector.broadcast %35 : vector<1x256xf32> to vector<32x256xf32>
    %96 = arith.mulf %94, %95 : vector<32x256xf32>
    %97 = vector.broadcast %36 : vector<1x256xf32> to vector<32x256xf32>
    %98 = arith.mulf %96, %97 : vector<32x256xf32>
    %c96 = arith.constant 96 : index
    %c0_59 = arith.constant 0 : index
    %99 = vector.load %arg16[%c96, %c0_59] : memref<144x32xbf16, #tpu.memory_space<vmem>>, vector<16x32xbf16>
    %100 = arith.truncf %98 : vector<32x256xf32> to vector<32x256xbf16>
    %cst_60 = arith.constant dense<0.000000e+00> : vector<16x256xf32>
    %101 = tpu.matmul %99, %100, %cst_60 {dimension_numbers = #tpu.dot_dimension_numbers<[1], [0], [0], [1], [0, 0, 1, 1], [], []>} : vector<16x32xbf16>, vector<32x256xbf16>, vector<16x256xf32> -> vector<16x256xf32>
    %102 = arith.addf %91, %101 : vector<16x256xf32>
    %cst_61 = arith.constant 0.000000e+00 : f32
    %103 = vector.broadcast %cst_61 : f32 to vector<32x16xf32>
    %104 = vector.extract_strided_slice %33 {offsets = [0, 16], sizes = [32, 240], strides = [1, 1]} : vector<32x256xf32> to vector<32x240xf32>
    %105 = tpu.concatenate %104, %103 in 1 : vector<32x240xf32>, vector<32x16xf32> -> vector<32x256xf32>
    %106 = vector.broadcast %35 : vector<1x256xf32> to vector<32x256xf32>
    %107 = arith.mulf %105, %106 : vector<32x256xf32>
    %c112 = arith.constant 112 : index
    %c0_62 = arith.constant 0 : index
    %108 = vector.load %arg16[%c112, %c0_62] : memref<144x32xbf16, #tpu.memory_space<vmem>>, vector<16x32xbf16>
    %109 = arith.truncf %107 : vector<32x256xf32> to vector<32x256xbf16>
    %cst_63 = arith.constant dense<0.000000e+00> : vector<16x256xf32>
    %110 = tpu.matmul %108, %109, %cst_63 {dimension_numbers = #tpu.dot_dimension_numbers<[1], [0], [0], [1], [0, 0, 1, 1], [], []>} : vector<16x32xbf16>, vector<32x256xbf16>, vector<16x256xf32> -> vector<16x256xf32>
    %111 = arith.addf %102, %110 : vector<16x256xf32>
    %cst_64 = arith.constant 0.000000e+00 : f32
    %112 = vector.broadcast %cst_64 : f32 to vector<32x17xf32>
    %113 = vector.extract_strided_slice %33 {offsets = [0, 17], sizes = [32, 239], strides = [1, 1]} : vector<32x256xf32> to vector<32x239xf32>
    %114 = tpu.concatenate %113, %112 in 1 : vector<32x239xf32>, vector<32x17xf32> -> vector<32x256xf32>
    %115 = vector.broadcast %35 : vector<1x256xf32> to vector<32x256xf32>
    %116 = arith.mulf %114, %115 : vector<32x256xf32>
    %117 = vector.broadcast %37 : vector<1x256xf32> to vector<32x256xf32>
    %118 = arith.mulf %116, %117 : vector<32x256xf32>
    %c128 = arith.constant 128 : index
    %c0_65 = arith.constant 0 : index
    %119 = vector.load %arg16[%c128, %c0_65] : memref<144x32xbf16, #tpu.memory_space<vmem>>, vector<16x32xbf16>
    %120 = arith.truncf %118 : vector<32x256xf32> to vector<32x256xbf16>
    %cst_66 = arith.constant dense<0.000000e+00> : vector<16x256xf32>
    %121 = tpu.matmul %119, %120, %cst_66 {dimension_numbers = #tpu.dot_dimension_numbers<[1], [0], [0], [1], [0, 0, 1, 1], [], []>} : vector<16x32xbf16>, vector<32x256xbf16>, vector<16x256xf32> -> vector<16x256xf32>
    %122 = arith.addf %111, %121 : vector<16x256xf32>
    %c0_67 = arith.constant 0 : index
    %c0_68 = arith.constant 0 : index
    %123 = vector.load %arg17[%c0_67, %c0_68] : memref<16x1xf32, #tpu.memory_space<vmem>>, vector<16x1xf32>
    %124 = vector.broadcast %123 : vector<16x1xf32> to vector<16x256xf32>
    %125 = arith.addf %122, %124 : vector<16x256xf32>
    %cst_69 = arith.constant 0.000000e+00 : f32
    %126 = vector.broadcast %cst_69 : f32 to vector<16x256xf32>
    %127 = arith.maximumf %125, %126 : vector<16x256xf32>
    %cst_70 = arith.constant 0.000000e+00 : f32
    %128 = vector.broadcast %cst_70 : f32 to vector<8x256xf32>
    %cst_71 = arith.constant 0.000000e+00 : f32
    %129 = vector.broadcast %cst_71 : f32 to vector<16x17xf32>
    %130 = vector.extract_strided_slice %127 {offsets = [0, 0], sizes = [16, 239], strides = [1, 1]} : vector<16x256xf32> to vector<16x239xf32>
    %131 = tpu.concatenate %129, %130 in 1 : vector<16x17xf32>, vector<16x239xf32> -> vector<16x256xf32>
    %132 = vector.broadcast %34 : vector<1x256xf32> to vector<16x256xf32>
    %133 = arith.mulf %131, %132 : vector<16x256xf32>
    %134 = vector.broadcast %36 : vector<1x256xf32> to vector<16x256xf32>
    %135 = arith.mulf %133, %134 : vector<16x256xf32>
    %c0_72 = arith.constant 0 : index
    %c0_73 = arith.constant 0 : index
    %136 = vector.load %arg18[%c0_72, %c0_73] : memref<72x16xbf16, #tpu.memory_space<vmem>>, vector<8x16xbf16>
    %137 = arith.truncf %135 : vector<16x256xf32> to vector<16x256xbf16>
    %cst_74 = arith.constant dense<0.000000e+00> : vector<8x256xf32>
    %138 = tpu.matmul %136, %137, %cst_74 {dimension_numbers = #tpu.dot_dimension_numbers<[1], [0], [0], [1], [0, 0, 1, 1], [], []>} : vector<8x16xbf16>, vector<16x256xbf16>, vector<8x256xf32> -> vector<8x256xf32>
    %139 = arith.addf %128, %138 : vector<8x256xf32>
    %cst_75 = arith.constant 0.000000e+00 : f32
    %140 = vector.broadcast %cst_75 : f32 to vector<16x16xf32>
    %141 = vector.extract_strided_slice %127 {offsets = [0, 0], sizes = [16, 240], strides = [1, 1]} : vector<16x256xf32> to vector<16x240xf32>
    %142 = tpu.concatenate %140, %141 in 1 : vector<16x16xf32>, vector<16x240xf32> -> vector<16x256xf32>
    %143 = vector.broadcast %34 : vector<1x256xf32> to vector<16x256xf32>
    %144 = arith.mulf %142, %143 : vector<16x256xf32>
    %c8 = arith.constant 8 : index
    %c0_76 = arith.constant 0 : index
    %145 = vector.load %arg18[%c8, %c0_76] : memref<72x16xbf16, #tpu.memory_space<vmem>>, vector<8x16xbf16>
    %146 = arith.truncf %144 : vector<16x256xf32> to vector<16x256xbf16>
    %cst_77 = arith.constant dense<0.000000e+00> : vector<8x256xf32>
    %147 = tpu.matmul %145, %146, %cst_77 {dimension_numbers = #tpu.dot_dimension_numbers<[1], [0], [0], [1], [0, 0, 1, 1], [], []>} : vector<8x16xbf16>, vector<16x256xbf16>, vector<8x256xf32> -> vector<8x256xf32>
    %148 = arith.addf %139, %147 : vector<8x256xf32>
    %cst_78 = arith.constant 0.000000e+00 : f32
    %149 = vector.broadcast %cst_78 : f32 to vector<16x15xf32>
    %150 = vector.extract_strided_slice %127 {offsets = [0, 0], sizes = [16, 241], strides = [1, 1]} : vector<16x256xf32> to vector<16x241xf32>
    %151 = tpu.concatenate %149, %150 in 1 : vector<16x15xf32>, vector<16x241xf32> -> vector<16x256xf32>
    %152 = vector.broadcast %34 : vector<1x256xf32> to vector<16x256xf32>
    %153 = arith.mulf %151, %152 : vector<16x256xf32>
    %154 = vector.broadcast %37 : vector<1x256xf32> to vector<16x256xf32>
    %155 = arith.mulf %153, %154 : vector<16x256xf32>
    %c16_79 = arith.constant 16 : index
    %c0_80 = arith.constant 0 : index
    %156 = vector.load %arg18[%c16_79, %c0_80] : memref<72x16xbf16, #tpu.memory_space<vmem>>, vector<8x16xbf16>
    %157 = arith.truncf %155 : vector<16x256xf32> to vector<16x256xbf16>
    %cst_81 = arith.constant dense<0.000000e+00> : vector<8x256xf32>
    %158 = tpu.matmul %156, %157, %cst_81 {dimension_numbers = #tpu.dot_dimension_numbers<[1], [0], [0], [1], [0, 0, 1, 1], [], []>} : vector<8x16xbf16>, vector<16x256xbf16>, vector<8x256xf32> -> vector<8x256xf32>
    %159 = arith.addf %148, %158 : vector<8x256xf32>
    %cst_82 = arith.constant 0.000000e+00 : f32
    %160 = vector.broadcast %cst_82 : f32 to vector<16x1xf32>
    %161 = vector.extract_strided_slice %127 {offsets = [0, 0], sizes = [16, 255], strides = [1, 1]} : vector<16x256xf32> to vector<16x255xf32>
    %162 = tpu.concatenate %160, %161 in 1 : vector<16x1xf32>, vector<16x255xf32> -> vector<16x256xf32>
    %163 = vector.broadcast %36 : vector<1x256xf32> to vector<16x256xf32>
    %164 = arith.mulf %162, %163 : vector<16x256xf32>
    %c24 = arith.constant 24 : index
    %c0_83 = arith.constant 0 : index
    %165 = vector.load %arg18[%c24, %c0_83] : memref<72x16xbf16, #tpu.memory_space<vmem>>, vector<8x16xbf16>
    %166 = arith.truncf %164 : vector<16x256xf32> to vector<16x256xbf16>
    %cst_84 = arith.constant dense<0.000000e+00> : vector<8x256xf32>
    %167 = tpu.matmul %165, %166, %cst_84 {dimension_numbers = #tpu.dot_dimension_numbers<[1], [0], [0], [1], [0, 0, 1, 1], [], []>} : vector<8x16xbf16>, vector<16x256xbf16>, vector<8x256xf32> -> vector<8x256xf32>
    %168 = arith.addf %159, %167 : vector<8x256xf32>
    %c32_85 = arith.constant 32 : index
    %c0_86 = arith.constant 0 : index
    %169 = vector.load %arg18[%c32_85, %c0_86] : memref<72x16xbf16, #tpu.memory_space<vmem>>, vector<8x16xbf16>
    %170 = arith.truncf %127 : vector<16x256xf32> to vector<16x256xbf16>
    %cst_87 = arith.constant dense<0.000000e+00> : vector<8x256xf32>
    %171 = tpu.matmul %169, %170, %cst_87 {dimension_numbers = #tpu.dot_dimension_numbers<[1], [0], [0], [1], [0, 0, 1, 1], [], []>} : vector<8x16xbf16>, vector<16x256xbf16>, vector<8x256xf32> -> vector<8x256xf32>
    %172 = arith.addf %168, %171 : vector<8x256xf32>
    %cst_88 = arith.constant 0.000000e+00 : f32
    %173 = vector.broadcast %cst_88 : f32 to vector<16x1xf32>
    %174 = vector.extract_strided_slice %127 {offsets = [0, 1], sizes = [16, 255], strides = [1, 1]} : vector<16x256xf32> to vector<16x255xf32>
    %175 = tpu.concatenate %174, %173 in 1 : vector<16x255xf32>, vector<16x1xf32> -> vector<16x256xf32>
    %176 = vector.broadcast %37 : vector<1x256xf32> to vector<16x256xf32>
    %177 = arith.mulf %175, %176 : vector<16x256xf32>
    %c40 = arith.constant 40 : index
    %c0_89 = arith.constant 0 : index
    %178 = vector.load %arg18[%c40, %c0_89] : memref<72x16xbf16, #tpu.memory_space<vmem>>, vector<8x16xbf16>
    %179 = arith.truncf %177 : vector<16x256xf32> to vector<16x256xbf16>
    %cst_90 = arith.constant dense<0.000000e+00> : vector<8x256xf32>
    %180 = tpu.matmul %178, %179, %cst_90 {dimension_numbers = #tpu.dot_dimension_numbers<[1], [0], [0], [1], [0, 0, 1, 1], [], []>} : vector<8x16xbf16>, vector<16x256xbf16>, vector<8x256xf32> -> vector<8x256xf32>
    %181 = arith.addf %172, %180 : vector<8x256xf32>
    %cst_91 = arith.constant 0.000000e+00 : f32
    %182 = vector.broadcast %cst_91 : f32 to vector<16x15xf32>
    %183 = vector.extract_strided_slice %127 {offsets = [0, 15], sizes = [16, 241], strides = [1, 1]} : vector<16x256xf32> to vector<16x241xf32>
    %184 = tpu.concatenate %183, %182 in 1 : vector<16x241xf32>, vector<16x15xf32> -> vector<16x256xf32>
    %185 = vector.broadcast %35 : vector<1x256xf32> to vector<16x256xf32>
    %186 = arith.mulf %184, %185 : vector<16x256xf32>
    %187 = vector.broadcast %36 : vector<1x256xf32> to vector<16x256xf32>
    %188 = arith.mulf %186, %187 : vector<16x256xf32>
    %c48_92 = arith.constant 48 : index
    %c0_93 = arith.constant 0 : index
    %189 = vector.load %arg18[%c48_92, %c0_93] : memref<72x16xbf16, #tpu.memory_space<vmem>>, vector<8x16xbf16>
    %190 = arith.truncf %188 : vector<16x256xf32> to vector<16x256xbf16>
    %cst_94 = arith.constant dense<0.000000e+00> : vector<8x256xf32>
    %191 = tpu.matmul %189, %190, %cst_94 {dimension_numbers = #tpu.dot_dimension_numbers<[1], [0], [0], [1], [0, 0, 1, 1], [], []>} : vector<8x16xbf16>, vector<16x256xbf16>, vector<8x256xf32> -> vector<8x256xf32>
    %192 = arith.addf %181, %191 : vector<8x256xf32>
    %cst_95 = arith.constant 0.000000e+00 : f32
    %193 = vector.broadcast %cst_95 : f32 to vector<16x16xf32>
    %194 = vector.extract_strided_slice %127 {offsets = [0, 16], sizes = [16, 240], strides = [1, 1]} : vector<16x256xf32> to vector<16x240xf32>
    %195 = tpu.concatenate %194, %193 in 1 : vector<16x240xf32>, vector<16x16xf32> -> vector<16x256xf32>
    %196 = vector.broadcast %35 : vector<1x256xf32> to vector<16x256xf32>
    %197 = arith.mulf %195, %196 : vector<16x256xf32>
    %c56 = arith.constant 56 : index
    %c0_96 = arith.constant 0 : index
    %198 = vector.load %arg18[%c56, %c0_96] : memref<72x16xbf16, #tpu.memory_space<vmem>>, vector<8x16xbf16>
    %199 = arith.truncf %197 : vector<16x256xf32> to vector<16x256xbf16>
    %cst_97 = arith.constant dense<0.000000e+00> : vector<8x256xf32>
    %200 = tpu.matmul %198, %199, %cst_97 {dimension_numbers = #tpu.dot_dimension_numbers<[1], [0], [0], [1], [0, 0, 1, 1], [], []>} : vector<8x16xbf16>, vector<16x256xbf16>, vector<8x256xf32> -> vector<8x256xf32>
    %201 = arith.addf %192, %200 : vector<8x256xf32>
    %cst_98 = arith.constant 0.000000e+00 : f32
    %202 = vector.broadcast %cst_98 : f32 to vector<16x17xf32>
    %203 = vector.extract_strided_slice %127 {offsets = [0, 17], sizes = [16, 239], strides = [1, 1]} : vector<16x256xf32> to vector<16x239xf32>
    %204 = tpu.concatenate %203, %202 in 1 : vector<16x239xf32>, vector<16x17xf32> -> vector<16x256xf32>
    %205 = vector.broadcast %35 : vector<1x256xf32> to vector<16x256xf32>
    %206 = arith.mulf %204, %205 : vector<16x256xf32>
    %207 = vector.broadcast %37 : vector<1x256xf32> to vector<16x256xf32>
    %208 = arith.mulf %206, %207 : vector<16x256xf32>
    %c64_99 = arith.constant 64 : index
    %c0_100 = arith.constant 0 : index
    %209 = vector.load %arg18[%c64_99, %c0_100] : memref<72x16xbf16, #tpu.memory_space<vmem>>, vector<8x16xbf16>
    %210 = arith.truncf %208 : vector<16x256xf32> to vector<16x256xbf16>
    %cst_101 = arith.constant dense<0.000000e+00> : vector<8x256xf32>
    %211 = tpu.matmul %209, %210, %cst_101 {dimension_numbers = #tpu.dot_dimension_numbers<[1], [0], [0], [1], [0, 0, 1, 1], [], []>} : vector<8x16xbf16>, vector<16x256xbf16>, vector<8x256xf32> -> vector<8x256xf32>
    %212 = arith.addf %201, %211 : vector<8x256xf32>
    %c0_102 = arith.constant 0 : index
    %c0_103 = arith.constant 0 : index
    %213 = vector.load %arg19[%c0_102, %c0_103] : memref<8x1xf32, #tpu.memory_space<vmem>>, vector<8x1xf32>
    %214 = vector.broadcast %213 : vector<8x1xf32> to vector<8x256xf32>
    %215 = arith.addf %212, %214 : vector<8x256xf32>
    %cst_104 = arith.constant 0.000000e+00 : f32
    %216 = vector.broadcast %cst_104 : f32 to vector<8x256xf32>
    %217 = arith.maximumf %215, %216 : vector<8x256xf32>
    %c0_105 = arith.constant 0 : index
    %c0_106 = arith.constant 0 : index
    %218 = vector.load %arg20[%c0_105, %c0_106] : memref<8x8xbf16, #tpu.memory_space<vmem>>, vector<8x8xbf16>
    %219 = arith.truncf %217 : vector<8x256xf32> to vector<8x256xbf16>
    %cst_107 = arith.constant dense<0.000000e+00> : vector<8x256xf32>
    %220 = tpu.matmul %218, %219, %cst_107 {dimension_numbers = #tpu.dot_dimension_numbers<[1], [0], [0], [1], [0, 0, 1, 1], [], []>} : vector<8x8xbf16>, vector<8x256xbf16>, vector<8x256xf32> -> vector<8x256xf32>
    %c0_108 = arith.constant 0 : index
    %c0_109 = arith.constant 0 : index
    %221 = vector.load %arg21[%c0_108, %c0_109] : memref<8x1xf32, #tpu.memory_space<vmem>>, vector<8x1xf32>
    %222 = vector.broadcast %221 : vector<8x1xf32> to vector<8x256xf32>
    %223 = arith.addf %220, %222 : vector<8x256xf32>
    %c0_110 = arith.constant 0 : index
    %c0_111 = arith.constant 0 : index
    %c0_112 = arith.constant 0 : index
    %224 = vector.load %arg22[%c0_110, %c0_111, %c0_112] : memref<1x8x256xf32, #tpu.memory_space<vmem>>, vector<1x8x256xf32>
    %225 = vector.shape_cast %224 : vector<1x8x256xf32> to vector<8x256xf32>
    %226 = vector.shape_cast %223 : vector<8x256xf32> to vector<1x8x256xf32>
    tpu.vector_store %arg22[%c0_110, %c0_111, %c0_112], %226 {strides = array<i32>} : memref<1x8x256xf32, #tpu.memory_space<vmem>>, vector<1x8x256xf32>,
    return
  }
  func.func @transform_0(%arg0: i32) -> (i32, i32, i32) {
    %c0_i32 = arith.constant 0 : i32
    %c0_i32_0 = arith.constant 0 : i32
    %c0_i32_1 = arith.constant 0 : i32
    return %arg0, %c0_i32, %c0_i32_0 : i32, i32, i32
  }
  func.func @transform_1(%arg0: i32) -> (i32, i32, i32) {
    %c0_i32 = arith.constant 0 : i32
    %c0_i32_0 = arith.constant 0 : i32
    %c0_i32_1 = arith.constant 0 : i32
    return %arg0, %c0_i32, %c0_i32_0 : i32, i32, i32
  }
  func.func @transform_2(%arg0: i32) -> (i32, i32, i32) {
    %c0_i32 = arith.constant 0 : i32
    %c0_i32_0 = arith.constant 0 : i32
    %c0_i32_1 = arith.constant 0 : i32
    return %arg0, %c0_i32, %c0_i32_0 : i32, i32, i32
  }
  func.func @transform_3(%arg0: i32) -> (i32, i32) {
    %c0_i32 = arith.constant 0 : i32
    %c0_i32_0 = arith.constant 0 : i32
    %c0_i32_1 = arith.constant 0 : i32
    return %c0_i32, %c0_i32_0 : i32, i32
  }
  func.func @transform_4(%arg0: i32) -> (i32, i32) {
    %c0_i32 = arith.constant 0 : i32
    %c0_i32_0 = arith.constant 0 : i32
    %c0_i32_1 = arith.constant 0 : i32
    return %c0_i32, %c0_i32_0 : i32, i32
  }
  func.func @transform_5(%arg0: i32) -> (i32, i32) {
    %c0_i32 = arith.constant 0 : i32
    %c0_i32_0 = arith.constant 0 : i32
    %c0_i32_1 = arith.constant 0 : i32
    return %c0_i32, %c0_i32_0 : i32, i32
  }
  func.func @transform_6(%arg0: i32) -> (i32, i32) {
    %c0_i32 = arith.constant 0 : i32
    %c0_i32_0 = arith.constant 0 : i32
    %c0_i32_1 = arith.constant 0 : i32
    return %c0_i32, %c0_i32_0 : i32, i32
  }
  func.func @transform_7(%arg0: i32) -> (i32, i32) {
    %c0_i32 = arith.constant 0 : i32
    %c0_i32_0 = arith.constant 0 : i32
    %c0_i32_1 = arith.constant 0 : i32
    return %c0_i32, %c0_i32_0 : i32, i32
  }
  func.func @transform_8(%arg0: i32) -> (i32, i32) {
    %c0_i32 = arith.constant 0 : i32
    %c0_i32_0 = arith.constant 0 : i32
    %c0_i32_1 = arith.constant 0 : i32
    return %c0_i32, %c0_i32_0 : i32, i32
  }
  func.func @transform_9(%arg0: i32) -> (i32, i32) {
    %c0_i32 = arith.constant 0 : i32
    %c0_i32_0 = arith.constant 0 : i32
    %c0_i32_1 = arith.constant 0 : i32
    return %c0_i32, %c0_i32_0 : i32, i32
  }
  func.func @transform_10(%arg0: i32) -> (i32, i32) {
    %c0_i32 = arith.constant 0 : i32
    %c0_i32_0 = arith.constant 0 : i32
    %c0_i32_1 = arith.constant 0 : i32
    return %c0_i32, %c0_i32_0 : i32, i32
  }
  func.func @transform_11(%arg0: i32) -> (i32, i32) {
    %c0_i32 = arith.constant 0 : i32
    %c0_i32_0 = arith.constant 0 : i32
    %c0_i32_1 = arith.constant 0 : i32
    return %c0_i32, %c0_i32_0 : i32, i32
  }
  func.func @transform_12(%arg0: i32) -> (i32, i32) {
    %c0_i32 = arith.constant 0 : i32
    %c0_i32_0 = arith.constant 0 : i32
    %c0_i32_1 = arith.constant 0 : i32
    return %c0_i32, %c0_i32_0 : i32, i32
  }
  func.func @transform_13(%arg0: i32) -> (i32, i32) {
    %c0_i32 = arith.constant 0 : i32
    %c0_i32_0 = arith.constant 0 : i32
    %c0_i32_1 = arith.constant 0 : i32
    return %c0_i32, %c0_i32_0 : i32, i32
  }
  func.func @transform_14(%arg0: i32) -> (i32, i32) {
    %c0_i32 = arith.constant 0 : i32
    %c0_i32_0 = arith.constant 0 : i32
    %c0_i32_1 = arith.constant 0 : i32
    return %c0_i32, %c0_i32_0 : i32, i32
  }
  func.func @transform_15(%arg0: i32) -> (i32, i32) {
    %c0_i32 = arith.constant 0 : i32
    %c0_i32_0 = arith.constant 0 : i32
    %c0_i32_1 = arith.constant 0 : i32
    return %c0_i32, %c0_i32_0 : i32, i32
  }
  func.func @transform_16(%arg0: i32) -> (i32, i32) {
    %c0_i32 = arith.constant 0 : i32
    %c0_i32_0 = arith.constant 0 : i32
    %c0_i32_1 = arith.constant 0 : i32
    return %c0_i32, %c0_i32_0 : i32, i32
  }
  func.func @transform_17(%arg0: i32) -> (i32, i32) {
    %c0_i32 = arith.constant 0 : i32
    %c0_i32_0 = arith.constant 0 : i32
    %c0_i32_1 = arith.constant 0 : i32
    return %c0_i32, %c0_i32_0 : i32, i32
  }
  func.func @transform_18(%arg0: i32) -> (i32, i32) {
    %c0_i32 = arith.constant 0 : i32
    %c0_i32_0 = arith.constant 0 : i32
    %c0_i32_1 = arith.constant 0 : i32
    return %c0_i32, %c0_i32_0 : i32, i32
  }
  func.func @transform_19(%arg0: i32) -> (i32, i32) {
    %c0_i32 = arith.constant 0 : i32
    %c0_i32_0 = arith.constant 0 : i32
    %c0_i32_1 = arith.constant 0 : i32
    return %c0_i32, %c0_i32_0 : i32, i32
  }
  func.func @transform_20(%arg0: i32) -> (i32, i32) {
    %c0_i32 = arith.constant 0 : i32
    %c0_i32_0 = arith.constant 0 : i32
    %c0_i32_1 = arith.constant 0 : i32
    return %c0_i32, %c0_i32_0 : i32, i32
  }
  func.func @transform_21(%arg0: i32) -> (i32, i32, i32) {
    %c0_i32 = arith.constant 0 : i32
    %c0_i32_0 = arith.constant 0 : i32
    %c0_i32_1 = arith.constant 0 : i32
    return %arg0, %c0_i32, %c0_i32_0 : i32, i32, i32
  }
}

</mosaic_0001>

<bundles_post_ra>
// kernel: forward.1
= control target key start
LH: loop header
LB: loop body
LE: loop exit
PB: predicated region body
PF: predicated region fallthrough
CT: control target
= control target key end

     0   :  { %s4175_s0 = inlined_call_operand.vmem [shape: bf16[2,4,256], index: 0, kind: input, shape index: {}]   ;;  %s4176_s1 = inlined_call_operand.vmem [shape: bf16[2,36,100], index: 1, kind: input, shape index: {}]   ;;  %s4177_s2 = inlined_call_operand.vmem [shape: bf16[2,36,36], index: 2, kind: input, shape index: {}]   ;;  %s4178_s3 = inlined_call_operand.vmem [shape: bf16[8,4], index: 3, kind: input, shape index: {}]   ;;  %s4179_s4 = inlined_call_operand.vmem [shape: f32[8,1], index: 4, kind: input, shape index: {}]   ;;  %s4180_s5 = inlined_call_operand.vmem [shape: bf16[16,36], index: 5, kind: input, shape index: {}]   ;;  %s4181_s6 = inlined_call_operand.vmem [shape: f32[16,1], index: 6, kind: input, shape index: {}]   ;;  %s4182_s7 = inlined_call_operand.vmem [shape: bf16[100,256], index: 7, kind: input, shape index: {}]   ;;  %s4183_s8 = inlined_call_operand.vmem [shape: bf16[8,36], index: 8, kind: input, shape index: {}]   ;;  %s4184_s9 = inlined_call_operand.vmem [shape: f32[8,1], index: 9, kind: input, shape index: {}]   ;;  %s4185_s10 = inlined_call_operand.vmem [shape: bf16[36,256], index: 10, kind: input, shape index: {}]   ;;  %s4186_s11 = inlined_call_operand.vmem [shape: f32[1,256], index: 11, kind: input, shape index: {}]   ;;  %s4187_s12 = inlined_call_operand.vmem [shape: f32[1,256], index: 12, kind: input, shape index: {}]   ;;  %s4188_s13 = inlined_call_operand.vmem [shape: f32[1,256], index: 13, kind: input, shape index: {}]   ;;  %s4189_s14 = inlined_call_operand.vmem [shape: f32[1,256], index: 14, kind: input, shape index: {}]   ;;  %s4190_s15 = inlined_call_operand.vmem [shape: bf16[144,32], index: 15, kind: input, shape index: {}]   ;;  %s4191_s16 = inlined_call_operand.vmem [shape: f32[16,1], index: 16, kind: input, shape index: {}]   ;;  %s4192_s17 = inlined_call_operand.vmem [shape: bf16[72,16], index: 17, kind: input, shape index: {}]   ;;  %s4193_s18 = inlined_call_operand.vmem [shape: f32[8,1], index: 18, kind: input, shape index: {}]   ;;  %s4194_s19 = inlined_call_operand.vmem [shape: bf16[8,8], index: 19, kind: input, shape index: {}]   ;;  %s4195_s20 = inlined_call_operand.vmem [shape: f32[8,1], index: 20, kind: input, shape index: {}]   ;;  %s4196_s21 = inlined_call_operand.vmem [shape: f32[2,8,256], index: 21, kind: output, shape index: {}]  }
   0x1   :  { %4210 = sst [smem:[#allocation16_spill]] %s4175_s0 }
   0x2   :  { %4211 = sst [smem:[#allocation17_spill]] %s4176_s1 }
   0x3   :  { %4212 = sst [smem:[#allocation18_spill]] %s4177_s2  ;;  %s3195_s2 = smov 0  }
   0x4   :  { %4213 = sst [smem:[#allocation19_spill]] %s4178_s3 }
   0x5   :  { %4214 = sst [smem:[#allocation20_spill]] %s4179_s4 }
   0x6   :  { %4215 = sst [smem:[#allocation21_spill]] %s4180_s5 }
   0x7   :  { %4216 = sst [smem:[#allocation22_spill]] %s4181_s6 }
   0x8   :  { %4217 = sst [smem:[#allocation23_spill]] %s4184_s9 }
   0x9   :  { %4218 = sst [smem:[#allocation24_spill]] %s4196_s21 }
   0xa LB: > { %4219 = sst [smem:[#allocation2_spill]] %s3072_s2  ;;  %s2892_s25 = sadd.s32 4294967295, %s3072_s2   ;;  %s3072_s2 = sphi %s3195_s2, %s31_s2  }
   0xb   : > { %p2896_p0 = scmp.ge.s32.totalorder %s3072_s2, 1  ;;  %p607_p1 = scmp.lt.s32.totalorder %s3072_s2, 3 }
   0xd   : > { %p608_p2 = pnand %p2896_p0, %p607_p1 }
   0xf   : > { %611 = sbr.rel (%p608_p2) target bundleno = 1466 (0x5ba), region = 104 }
  0x14   : > { %p677_p3 = scmp.lt.s32.totalorder %s2892_s25, 1  ;;  %v3074_v0 = vmov 0.0   ;;  %vm3075_vm0 = vmmov 0   ;;  %s4220_s6 = sld [smem:[#allocation22_spill]]  ;;  %v4198_v2 = vmov 0   ;;  %vm719_vm1 = vcmask 1041408  }
  0x15   : > { %2980 = vmatprep.subr.bf16.mxu1 %v3074_v0  ;;  %2986 = vmatprep.mubr.msk.bf16.mxu1 %vm3075_vm0, %v3074_v0  ;;  %s4221_s9 = sld [smem:[#allocation23_spill]]  ;;  %v871_v6 = vld [vmem:[%s4182_s7 + $0x60] sm:$0x33]  ;;  %vm715_vm2 = vcmask 31744   ;;  %v3033_v17 = vld [vmem:[%s4182_s7 + $0x54] ss:$8 sps:$4 sm:$0xff]  }
  0x16   : > { %s4262_s25 = smov (!%p677_p3, %s2892_s25), 1  ;;  %758 = vmatprep.mubr.bf16.mxu0 %v4198_v2  ;;  %3020 = vset.pattern.permute.xlu0 %v4198_v2  ;;  %s4222_s23 = sld [smem:[#allocation16_spill]]  ;;  %v2924_v12 = vcombine.high %v871_v6, %v871_v6  ;;  %v2923_v13 = vcombine.low %v871_v6, %v871_v6  ;;  %v3031_v21 = vld [vmem:[%s4182_s7 + $0x50] ss:$8 sps:$4 sm:$0xff]   ;;  %vm808_vm3 = vcmask 293888   ;;  %vm937_vm4 = vcmask 818176  }
  0x17   : > { %s3000_s29 = smul.u32 20, %s4262_s25  ;;  %s2970_s0 = sshll.u32 %s4262_s25, 2  ;;  %3021 = vset.pattern.permute.xlu1 %v4198_v2  ;;  %v3036_v22 = vld [vmem:[%s4182_s7 + $0x44] ss:$8 sps:$4 sm:$0xff]   ;;  %v3034_v24 = vld [vmem:[%s4182_s7 + $0x40] ss:$8 sps:$4 sm:$0xff]  }
  0x18   : > { %s4223_s27 = sld [smem:[#allocation20_spill]]  ;;  %v942_v19 = vsel %vm719_vm1, %v2923_v13, 0  ;;  %v3039_v26 = vld [vmem:[%s4182_s7 + $0x34] ss:$8 sps:$4 sm:$0xff]   ;;  %v3037_v27 = vld [vmem:[%s4182_s7 + $0x30] ss:$8 sps:$4 sm:$0xff]  }
  0x19   : > { %s4224_s4 = sld [smem:[#allocation17_spill]]  ;;  %v3042_v29 = vld [vmem:[%s4182_s7 + $0x24] ss:$8 sps:$4 sm:$0xff]   ;;  %v3040_v30 = vld [vmem:[%s4182_s7 + $0x20] ss:$8 sps:$4 sm:$0xff]   ;;  %s3077_s24 = smov 16  }
  0x1a   : > { %v776_v1 = vld [vmem:[%s4220_s6] sm:$0xff]  ;;  %v777_v4 = vld [vmem:[%s4220_s6 + $0x8] sm:$0xff]  ;;  %s4225_s5 = sld [smem:[#allocation18_spill]]  ;;  %v3045_v32 = vld [vmem:[%s4182_s7 + $0x14] ss:$8 sps:$4 sm:$0xff]   ;;  %s3078_s26 = smov 17  }
  0x1b   : > { %v996_v3 = vld [vmem:[%s4221_s9] sm:$0xff]  ;;  %780 = vperm.xlu0 %3020, %v776_v1   ;;  %s4226_s6 = sld [smem:[#allocation19_spill]]  ;;  %v3043_v33 = vld [vmem:[%s4182_s7 + $0x10] ss:$8 sps:$4 sm:$0xff]   ;;  %v3053_v40 = vld [vmem:[%s4185_s10 + $0x14] ss:$8 sps:$4 sm:$0xff]  }
  0x1c   : > { %s681_s1 = scalar_lea.vmem %s4222_s23, %s2970_s0  ;;  %999 = vperm.xlu1 %3021, %v996_v3   ;;  %v995_v31 = vld [vmem:[%s4183_s8] sm:$0xf]  ;;  %v3048_v35 = vld [vmem:[%s4182_s7 + $0x4] ss:$8 sps:$4 sm:$0xff]   ;;  %v3051_v41 = vld [vmem:[%s4185_s10 + $0x10] ss:$8 sps:$4 sm:$0xff]  }
  0x1d   : > { %v2903_v7 = vld.sshfl [vmem:[%s681_s1] sm:$0x33 pattern:$0x76325410]  ;;  %s4227_s1 = sld [smem:[#allocation21_spill]]  ;;  %s3080_s3 = smov 1  }
  0x1e   : > { %v700_v5 = vld [vmem:[%s4223_s27] sm:$0xff]  ;;  %v714_v9 = vcombine.high %v2903_v7, %v2903_v7  ;;  %v721_v14 = vsel %vm719_vm1, %v2903_v7, 0  ;;  %s3079_s27 = smov 15   ;;  %s3081_s28 = smov 127   ;;  %vm1173_vm5 = vcmask 138240   ;;  %vm1400_vm6 = vcmask 121856  }
  0x1f   : > { %s686_s30 = scalar_lea.vmem %s4224_s4, %s3000_s29  ;;  %785 = vperm.xlu0 %3020, %v777_v4   ;;  %v1069_v34 = vld [vmem:[%s4185_s10 + $0x20] sm:$0x33]  ;;  %s3082_s4 = smov 113   ;;  %vm1684_vm7 = vcmask 1039360   ;;  %vm1521_vm8 = vcmask 7168   ;;  %vm1786_vm9 = vcmask 924672  }
  0x20   : > { %v3022_v8 = vld [vmem:[%s686_s30 + $0x10] ss:$0 sps:$4 sm:$0x33]   ;;  %s3237_s0 = scalar_lea.vmem %s4225_s5, %s3000_s29  ;;  %2904 = vmatprep.subr.msk.bf16.mxu0 %vm719_vm1, %v714_v9  ;;  %703 = vperm.xlu1 %3021, %v700_v5   ;;  %v3023_v11 = vld [vmem:[%s686_s30 + $0x8] sm:$0xff]   ;;  %v3024_v16 = vld [vmem:[%s686_s30] sm:$0xff]   ;;  %v2936_v36 = vcombine.high %v1069_v34, %v1069_v34  ;;  %v2935_v37 = vcombine.low %v1069_v34, %v1069_v34  ;;  %s3083_s30 = smov 112  }
  0x21   : > { %v813_v10 = vsel %vm719_vm1, %v3022_v8, 0  ;;  %v699_v15 = vld [vmem:[%s4226_s6] sm:$0xf]  ;;  %741 = vmatpush1.bf16.msra.mxu0 %v721_v14  ;;  %v3026_v18 = vld [vmem:[%s3237_s0 + $0x10] ss:$0 sps:$4 sm:$0x33]  }
  0x22   : > { %2981 = vmatpush3.bf16.msra.mxu1 %v813_v10  ;;  %2925 = vmatprep.subr.msk.bf16.mxu0 %vm719_vm1, %v2924_v12  ;;  %v1021_v23 = vsel %vm719_vm1, %v3026_v18, 0  ;;  %v3027_v25 = vld [vmem:[%s3237_s0 + $0x8] sm:$0xff]   ;;  %v3028_v28 = vld [vmem:[%s3237_s0] sm:$0xff]   ;;  %v1099_v39 = vsel %vm719_vm1, %v2935_v37, 0  ;;  %s3084_s5 = smov 111   ;;  %vm1250_vm10 = vcmask 130048  }
  0x23   : > { %2982 = vmatprep.subr.bf16.mxu1 %v3074_v0  ;;  %v3025_v20 = vld [vmem:[%s4227_s1] sm:$0xff]   ;;  %vm1286_vm11 = vcmask 261120   ;;  %vm2009_vm12 = vcmask 908288   ;;  %vm1907_vm13 = vcmask 916480   ;;  %vm2763_vm14 = vcmask 1043456   ;;  %s4259_s22 = sld [smem:[#allocation24_spill]] }
  0x24   : > { %2905 = vmatmul.mubr.msk.bf16.vlgmr.msra.gmra.mxu0 %vm715_vm2, %v699_v15  ;;  %v3046_v38 = vld [vmem:[%s4182_s7] ss:$8 sps:$4 sm:$0xff]   ;;  %v3056_v42 = vld [vmem:[%s4185_s10 + $0x4] ss:$8 sps:$4 sm:$0xff]   ;;  %vm2759_vm15 = vcmask 64512  }
  0x25   : > { %950 = vmatpush1.bf16.msra.mxu0 %v942_v19  ;;  %979 = vmatprep.mubr.bf16.mxu0 %v4198_v2  ;;  %v3054_v43 = vld [vmem:[%s4185_s10] ss:$8 sps:$4 sm:$0xff]  }
  0x26   : > { %2983 = vmatpush3.bf16.msra.mxu1 %v3023_v11  ;;  %951 = vmatprep.subr.bf16.mxu0 %v3033_v17 }
  0x27   : > { %2984 = vmatprep.subr.bf16.mxu1 %v3074_v0 }
  0x29   : > { %952 = vmatpush1.bf16.msra.mxu0 %v3031_v21 }
  0x2a   : > { %2985 = vmatpush3.bf16.msra.mxu1 %v3024_v16  ;;  %953 = vmatprep.subr.bf16.mxu0 %v3036_v22 }
  0x2b   : > { %2990 = vmatprep.subr.bf16.mxu1 %v3074_v0 }
  0x2d   : > { %2987 = vmatmul.mubr.msk.bf16.vlgmr.msra.gmra.mxu1 %vm808_vm3, %v3025_v20  ;;  %954 = vmatpush1.bf16.msra.mxu0 %v3034_v24 }
  0x2e   : > { %2991 = vmatpush3.bf16.msra.mxu1 %v1021_v23  ;;  %2996 = vmatprep.mubr.msk.bf16.mxu1 %vm3075_vm0, %v3074_v0 }
  0x2f   : > { %2992 = vmatprep.subr.bf16.mxu1 %v3074_v0  ;;  %955 = vmatprep.subr.bf16.mxu0 %v3039_v26 }
  0x31   : > { %956 = vmatpush1.bf16.msra.mxu0 %v3037_v27 }
  0x32   : > { %2993 = vmatpush3.bf16.msra.mxu1 %v3027_v25  ;;  %957 = vmatprep.subr.bf16.mxu0 %v3042_v29 }
  0x33   : > { %2994 = vmatprep.subr.bf16.mxu1 %v3074_v0 }
  0x35   : > { %958 = vmatpush1.bf16.msra.mxu0 %v3040_v30  ;;  %v2103_v30 = vld [vmem:[%s4191_s16] sm:$0xff] }
  0x36   : > { %2995 = vmatpush3.bf16.msra.mxu1 %v3028_v28  ;;  %959 = vmatprep.subr.bf16.mxu0 %v3045_v32 }
  0x37   : > { %2937 = vmatprep.subr.msk.bf16.mxu1 %vm719_vm1, %v2936_v36 }
  0x39   : > { %2997 = vmatmul.mubr.msk.bf16.vlgmr.msra.gmra.mxu1 %vm808_vm3, %v995_v31  ;;  %960 = vmatpush1.bf16.msra.mxu0 %v3043_v33  ;;  %v2104_v31 = vld [vmem:[%s4191_s16 + $0x8] sm:$0xff] }
  0x3a   : > { %1136 = vmatprep.mubr.bf16.mxu1 %v4198_v2  ;;  %961 = vmatprep.subr.bf16.mxu0 %v3048_v35 }
  0x3b   : > { %1115 = vmatpush1.bf16.msra.mxu1 %v1099_v39 }
  0x3c   : > { %1116 = vmatprep.subr.bf16.mxu1 %v3053_v40 }
  0x3d   : > { %962 = vmatpush1.bf16.msra.mxu0 %v3046_v38  ;;  %v1191_v38 = vlaneseq }
  0x3f   : > { %1117 = vmatpush1.bf16.msra.mxu1 %v3051_v41  ;;  %v1192_v41 = vshrl.u32 %v1191_v38, 7 }
  0x40   : > { %1118 = vmatprep.subr.bf16.mxu1 %v3056_v42 }
  0x43   : > { %1119 = vmatpush1.bf16.msra.mxu1 %v3054_v43 }
  0x96   : > { %v781_v49 = vpop.permute.xlu0 %780 }
  0x97   : > { %v1000_v44 = vpop.permute.xlu1 %999 }
  0x9a   : > { %v786_v58 = vpop.permute.xlu0 %785 }
  0x9b   : > { %v704_v45 = vpop.permute.xlu1 %703 }
  0xe4   : > { %v760_v46 = vpop.f32.mrf.mxu0 }
  0xe5   : > { %v761_v47 = vadd.f32 %v760_v46, %v704_v45 }
  0xe6   : > { %v762_v48 = vpop.f32.mrf.mxu0 }
  0xe7   : > { %v3321_v50 = vmax.f32 %v761_v47, 0.0  ;;  %v763_v51 = vadd.f32 %v762_v48, %v704_v45  ;;  %v1147_v45 = vld [vmem:[%s4188_s13] sm:$0x3]  ;;  %v1193_v48 = vsub.s32 0, %v1192_v41 }
  0xe8   : > { %v764_v52 = vpop.f32.mrf.mxu0 }
  0xe9   : > { %1234 = vrot.lane.b32.xlu0 %v3321_v50, %s3077_s24  ;;  %v3325_v54 = vmax.f32 %v763_v51, 0.0 }
  0xea   : > { %v765_v55 = vpop.f32.mrf.mxu0 }
  0xeb   : > { %1236 = vrot.lane.b32.xlu1 %v3325_v54, %s3077_s24 }
  0xed   : > { %v849_v53 = vpop.f32.mrf.mxu1  ;;  %1157 = vrot.lane.b32.xlu0 %v3321_v50, %s3078_s26 }
  0xee   : > { %v850_v57 = vadd.f32 %v849_v53, %v781_v49  ;;  %v1148_v49 = vld [vmem:[%s4189_s14] sm:$0x3] }
  0xef   : > { %v2988_v56 = vpop.f32.mrf.mxu1  ;;  %1159 = vrot.lane.b32.xlu1 %v3325_v54, %s3078_s26 }
  0xf0   : > { %v856_v62 = vmax.f32 %v850_v57, 0.0  ;;  %v3533_v56 = vrot.slane %v1148_v49, %v1193_v48  ;;  %v1146_v57 = vld [vmem:[%s4187_s12] sm:$0x3] }
  0xf1   : > { %v852_v59 = vpop.f32.mrf.mxu1  ;;  %1384 = vrot.lane.b32.xlu0 %v3321_v50, %s3079_s27 }
  0xf2   : > { %v853_v60 = vadd.f32 %v852_v59, %v786_v58 }
  0xf3   : > { %v2989_v61 = vpop.f32.mrf.mxu1  ;;  %1386 = vrot.lane.b32.xlu1 %v3325_v54, %s3079_s27 }
  0xf4   : > { %v857_v63 = vmax.f32 %v853_v60, 0.0 }
  0xf5   : > { %1505 = vrot.lane.b32.xlu0 %v3321_v50, %s3080_s3 }
  0xf6   : > { %v858_v0 = vpack.c.bf16 %v857_v63, %v856_v62  ;;  %v3551_v63 = vrot.slane %v1146_v57, %v1193_v48 }
  0xf7   : > { %1507 = vrot.lane.b32.xlu1 %v3325_v54, %s3080_s3 }
  0xf8   : > { %2926 = vmatmul.mubr.msk.bf16.vlgmr.msra.gmra.mxu0 %vm937_vm4, %v858_v0 }
  0xf9   : > { %v1057_v1 = vpop.f32.mrf.mxu1  ;;  %1322 = vmatprep.mubr.bf16.mxu0 %v4198_v2  ;;  %1668 = vrot.lane.b32.xlu0 %v3321_v50, %s3081_s28 }
  0xfa   : > { %v1058_v3 = vadd.f32 %v1057_v1, %v1000_v44  ;;  %v3514_v44 = vsub.s32 1, %v1192_v41 }
  0xfb   : > { %v2998_v4 = vpop.f32.mrf.mxu1 }
  0xfc   : > { %v1063_v5 = vmax.f32 %v1058_v3, 0.0  ;;  %v3527_v51 = vrot.slane %v1147_v45, %v3514_v44  ;;  %v3541_v59 = vrot.slane %v1148_v49, %v3514_v44 }
  0xfd   : > { %v1060_v6 = vpop.f32.mrf.mxu1  ;;  %1770 = vrot.lane.b32.xlu0 %v3321_v50, %s3082_s4 }
  0xfe   : > { %v1064_v7 = vpack.c.bf16 %v1063_v5, %v1063_v5 }
  0xff   : > { %v2999_v8 = vpop.f32.mrf.mxu1 }
 0x100   : > { %2938 = vmatmul.mubr.msk.bf16.vlgmr.msra.gmra.mxu1 %vm808_vm3, %v1064_v7 }
 0x101   : > { %1373 = vmatprep.mubr.bf16.mxu1 %v4198_v2  ;;  %1670 = vrot.lane.b32.xlu0 %v3325_v54, %s3081_s28 }
 0x105   : > { %1772 = vrot.lane.b32.xlu0 %v3325_v54, %s3082_s4 }
 0x15b   : > { %v3352_v9 = vpop.permute.xlu0 %1234 }
 0x15d   : > { %v3354_v10 = vpop.permute.xlu1 %1236 }
 0x15f   : > { %v3356_v11 = vpop.permute.xlu0 %1157 }
 0x161   : > { %v1160_v12 = vpop.permute.xlu1 %1159 }
 0x162   : > { %v3360_v13 = vsel %vm1173_vm5, %v3356_v11, %v1160_v12 }
 0x163   : > { %v3362_v14 = vpop.permute.xlu0 %1384 }
 0x165   : > { %v1387_v15 = vpop.permute.xlu1 %1386 }
 0x166   : > { %v3366_v16 = vsel %vm1400_vm6, %v3362_v14, %v1387_v15 }
 0x167   : > { %v3368_v17 = vpop.permute.xlu0 %1505 }
 0x169   : > { %v1508_v32 = vpop.permute.xlu1 %1507 }
 0x16a   : > { %v1522_v52 = vsel %vm1521_vm8, %v3368_v17, %v1508_v32 }
 0x16b   : > { %v1669_v18 = vpop.permute.xlu0 %1668  ;;  %v3544_v60 = vmul.f32 %v1522_v52, %v3527_v51 }
 0x16d   : > { %4228 = vst [vmem:[#allocation3_spill] sm:$0xff] %v3544_v60 }
 0x16f   : > { %v3370_v19 = vpop.permute.xlu0 %1770 }
 0x173   : > { %v3372_v20 = vpop.permute.xlu0 %1670 }
 0x174   : > { %v3376_v21 = vsel %vm1684_vm7, %v1669_v18, %v3372_v20  ;;  %v1697_v62 = vsel %vm1684_vm7, %v3372_v20, 0.0 }
 0x175   : > { %v3564_v7 = vmul.f32 %v3376_v21, %v3533_v56  ;;  %v3567_v8 = vmul.f32 %v1697_v62, %v3541_v59 }
 0x177   : > { %v3500_v33 = vpop.permute.xlu0 %1772  ;;  %4229 = vst [vmem:[#allocation4_spill] sm:$0xff] %v3564_v7  ;;  %4230 = vst [vmem:[#allocation5_spill] sm:$0xff] %v3567_v8  ;;  %v3645_v8 = vrot.slane %v1146_v57, %v3514_v44 }
 0x178   : > { %v1787_v4 = vsel %vm1786_vm9, %v3370_v19, %v3500_v33  ;;  %v1186_v19 = vsel %vm1173_vm5, 0.0, %v3356_v11 }
 0x179   : > { %v1814_v18 = vmul.f32 %v3551_v63, %v1787_v4 }
 0x1b8   : > { %v3378_v22 = vpop.f32.mrf.mxu0 }
 0x1b9   : > { %1672 = vrot.lane.b32.xlu1 %v3378_v22, %s3081_s28  ;;  %1238 = vrot.lane.b32.xlu0 %v3378_v22, %s3077_s24 }
 0x1ba   : > { %v3388_v23 = vpop.f32.mrf.mxu0 }
 0x1bc   : > { %v3402_v28 = vpop.f32.mrf.mxu0 }
 0x1bd   : > { %1774 = vrot.lane.b32.xlu1 %v3378_v22, %s3082_s4  ;;  %1161 = vrot.lane.b32.xlu0 %v3378_v22, %s3078_s26 }
 0x1be   : > { %v3420_v29 = vpop.f32.mrf.mxu0 }
 0x1c0   : > { %v3390_v24 = vpop.f32.mrf.mxu1 }
 0x1c1   : > { %1240 = vrot.lane.b32.xlu1 %v3388_v23, %s3077_s24  ;;  %1388 = vrot.lane.b32.xlu0 %v3378_v22, %s3079_s27 }
 0x1c2   : > { %v3396_v25 = vpop.f32.mrf.mxu1 }
 0x1c4   : > { %v1142_v26 = vpop.f32.mrf.mxu1 }
 0x1c5   : > { %1163 = vrot.lane.b32.xlu1 %v3388_v23, %s3078_s26  ;;  %1509 = vrot.lane.b32.xlu0 %v3378_v22, %s3080_s3 }
 0x1c6   : > { %v1143_v27 = vpop.f32.mrf.mxu1 }
 0x1c9   : > { %1390 = vrot.lane.b32.xlu1 %v3388_v23, %s3079_s27  ;;  %1242 = vrot.lane.b32.xlu0 %v3402_v28, %s3077_s24 }
 0x1cd   : > { %1511 = vrot.lane.b32.xlu1 %v3388_v23, %s3080_s3  ;;  %1165 = vrot.lane.b32.xlu0 %v3402_v28, %s3078_s26 }
 0x1d1   : > { %1674 = vrot.lane.b32.xlu1 %v3388_v23, %s3081_s28  ;;  %1392 = vrot.lane.b32.xlu0 %v3402_v28, %s3079_s27 }
 0x1d5   : > { %1776 = vrot.lane.b32.xlu1 %v3388_v23, %s3082_s4  ;;  %1513 = vrot.lane.b32.xlu0 %v3402_v28, %s3080_s3 }
 0x1d9   : > { %1244 = vrot.lane.b32.xlu1 %v3420_v29, %s3077_s24  ;;  %1676 = vrot.lane.b32.xlu0 %v3402_v28, %s3081_s28 }
 0x1dd   : > { %1167 = vrot.lane.b32.xlu1 %v3420_v29, %s3078_s26  ;;  %1778 = vrot.lane.b32.xlu0 %v3402_v28, %s3082_s4 }
 0x1e1   : > { %1394 = vrot.lane.b32.xlu1 %v3420_v29, %s3079_s27  ;;  %1678 = vrot.lane.b32.xlu0 %v3420_v29, %s3081_s28 }
 0x1e5   : > { %1515 = vrot.lane.b32.xlu1 %v3420_v29, %s3080_s3  ;;  %1780 = vrot.lane.b32.xlu0 %v3420_v29, %s3082_s4 }
 0x1e9   : > { %1897 = vrot.lane.b32.xlu1 %v3388_v23, %s3083_s30  ;;  %1901 = vrot.lane.b32.xlu0 %v3420_v29, %s3083_s30 }
 0x1ed   : > { %1680 = vrot.lane.b32.xlu1 %v3390_v24, %s3081_s28  ;;  %1246 = vrot.lane.b32.xlu0 %v3390_v24, %s3077_s24 }
 0x1f1   : > { %1782 = vrot.lane.b32.xlu1 %v3390_v24, %s3082_s4  ;;  %1169 = vrot.lane.b32.xlu0 %v3390_v24, %s3078_s26 }
 0x1f5   : > { %1903 = vrot.lane.b32.xlu1 %v3390_v24, %s3083_s30  ;;  %1396 = vrot.lane.b32.xlu0 %v3390_v24, %s3079_s27 }
 0x1f9   : > { %2005 = vrot.lane.b32.xlu1 %v3390_v24, %s3084_s5  ;;  %2003 = vrot.lane.b32.xlu0 %v3420_v29, %s3084_s5 }
 0x1fd   : > { %1248 = vrot.lane.b32.xlu1 %v3396_v25, %s3077_s24  ;;  %1517 = vrot.lane.b32.xlu0 %v3390_v24, %s3080_s3 }
 0x201   : > { %1171 = vrot.lane.b32.xlu1 %v3396_v25, %s3078_s26  ;;  %1899 = vrot.lane.b32.xlu0 %v3402_v28, %s3083_s30 }
 0x205   : > { %1398 = vrot.lane.b32.xlu1 %v3396_v25, %s3079_s27  ;;  %2001 = vrot.lane.b32.xlu0 %v3402_v28, %s3084_s5 }
 0x209   : > { %1999 = vrot.lane.b32.xlu1 %v3388_v23, %s3084_s5  ;;  %1893 = vrot.lane.b32.xlu0 %v3325_v54, %s3083_s30 }
 0x20d   : > { %1519 = vrot.lane.b32.xlu1 %v3396_v25, %s3080_s3  ;;  %1995 = vrot.lane.b32.xlu0 %v3325_v54, %s3084_s5 }
 0x211   : > { %1682 = vrot.lane.b32.xlu1 %v3396_v25, %s3081_s28  ;;  %1891 = vrot.lane.b32.xlu0 %v3321_v50, %s3083_s30 }
 0x215   : > { %1784 = vrot.lane.b32.xlu1 %v3396_v25, %s3082_s4  ;;  %1993 = vrot.lane.b32.xlu0 %v3321_v50, %s3084_s5 }
 0x219   : > { %1905 = vrot.lane.b32.xlu1 %v3396_v25, %s3083_s30  ;;  %2107 = vperm.xlu0 %3020, %v2103_v30   ;;  %v3586_v30 = vrot.slane %v1147_v45, %v1193_v48 }
 0x21b   : > { %v3590_v32 = vmul.f32 %v1814_v18, %v3586_v30  ;;  %v1145_v18 = vld [vmem:[%s4186_s11] sm:$0x3] }
 0x21c   : > { %v3618_v49 = vrot.slane %v1145_v18, %v1193_v48  ;;  %v3623_v21 = vrot.slane %v1145_v18, %v3514_v44  ;;  %v1251_v48 = vsel %vm1250_vm10, %v3352_v9, %v3354_v10 }
 0x21d   : > { %2007 = vrot.lane.b32.xlu1 %v3396_v25, %s3084_s5  ;;  %4233 = vst [vmem:[#allocation8_spill] sm:$0xff] %v3590_v32  ;;  %v1263_v32 = vsel %vm1250_vm10, 0.0, %v3352_v9 }
 0x21e   : > { %v1202_v7 = vmul.f32 %v3623_v21, %v3360_v13  ;;  %v3656_v13 = vsel %vm1400_vm6, 0.0, %v3362_v14 }
 0x221   : > { %1895 = vrot.lane.b32.xlu1 %v3378_v22, %s3083_s30 }
 0x225   : > { %1997 = vrot.lane.b32.xlu1 %v3378_v22, %s3084_s5 }
 0x229   : > { %2112 = vperm.xlu1 %3021, %v2104_v31  }
 0x22b   : > { %v1673_v34 = vpop.permute.xlu1 %1672  ;;  %v3502_v35 = vpop.permute.xlu0 %1238 }
 0x22c   : > { %v1264_v9 = vsel %vm1250_vm10, 0.0, %v3502_v35 }
 0x22f   : > { %v1775_v36 = vpop.permute.xlu1 %1774  ;;  %v3504_v37 = vpop.permute.xlu0 %1161 }
 0x233   : > { %v3506_v39 = vpop.permute.xlu1 %1240  ;;  %v3508_v40 = vpop.permute.xlu0 %1388 }
 0x234   : > { %v1252_v44 = vsel %vm1250_vm10, %v3502_v35, %v3506_v39  ;;  %v1269_v35 = vmul.f32 %v1264_v9, %v3618_v49 }
 0x237   : > { %v3510_v42 = vpop.permute.xlu1 %1163  ;;  %v3512_v43 = vpop.permute.xlu0 %1509 }
 0x23b   : > { %v3519_v46 = vpop.permute.xlu1 %1390  ;;  %v3521_v47 = vpop.permute.xlu0 %1242 }
 0x23c   : > { %v1265_v14 = vsel %vm1250_vm10, 0.0, %v3521_v47 }
 0x23f   : > { %v1512_v53 = vpop.permute.xlu1 %1511  ;;  %v3531_v55 = vpop.permute.xlu0 %1165 }
 0x240   : > { %v1523_v58 = vsel %vm1521_vm8, %v3512_v43, %v1512_v53 }
 0x241   : > { %v3547_v61 = vmul.f32 %v1523_v58, %v3527_v51 }
 0x243   : > { %v1675_v0 = vpop.permute.xlu1 %1674  ;;  %v3553_v1 = vpop.permute.xlu0 %1392 }
 0x244   : > { %v1686_v5 = vsel %vm1684_vm7, %v1673_v34, %v1675_v0  ;;  %v1698_v6 = vsel %vm1684_vm7, %v1675_v0, 0.0 }
 0x245   : > { %v3570_v12 = vmul.f32 %v1686_v5, %v3533_v56  ;;  %v3573_v15 = vmul.f32 %v1698_v6, %v3541_v59 }
 0x247   : > { %4231 = vst [vmem:[#allocation6_spill] sm:$0xff] %v3570_v12  ;;  %4232 = vst [vmem:[#allocation7_spill] sm:$0xff] %v3573_v15  ;;  %v3578_v20 = vpop.permute.xlu1 %1776  ;;  %v3580_v26 = vpop.permute.xlu0 %1513  ;;  %v3642_v12 = vmul.f32 %v1263_v32, %v3618_v49  ;;  %v3659_v32 = vmul.f32 %v3527_v51, %v1202_v7 }
 0x248   : > { %v1788_v27 = vsel %vm1786_vm9, %v1775_v36, %v3578_v20 }
 0x249   : > { %v1816_v31 = vmul.f32 %v3551_v63, %v1788_v27 }
 0x24b   : > { %v3593_v34 = vmul.f32 %v1816_v31, %v3586_v30  ;;  %v1245_v38 = vpop.permute.xlu1 %1244  ;;  %v3595_v41 = vpop.permute.xlu0 %1676 }
 0x24c   : > { %v1253_v57 = vsel %vm1250_vm10, %v3521_v47, %v1245_v38 }
 0x24d   : > { %4234 = vst [vmem:[#allocation9_spill] sm:$0xff] %v3593_v34  ;;  %v1201_v34 = vmul.f32 %v3618_v49, %v1186_v19  ;;  %v1268_v19 = vmul.f32 %v1251_v48, %v3623_v21  ;;  %v1175_v48 = vsel %vm1173_vm5, %v3504_v37, %v3510_v42  ;;  %v1188_v42 = vsel %vm1173_vm5, 0.0, %v3531_v55 }
 0x24e   : > { %v1272_v47 = vmul.f32 %v1253_v57, %v3623_v21  ;;  %v1204_v9 = vmul.f32 %v3623_v21, %v1175_v48 }
 0x24f   : > { %v1168_v52 = vpop.permute.xlu1 %1167  ;;  %v3599_v53 = vpop.permute.xlu0 %1778  ;;  %v3648_v15 = vmul.f32 %v3586_v30, %v1201_v34  ;;  %v3668_v34 = vmul.f32 %v3366_v16, %v3623_v21 }
 0x250   : > { %v1176_v39 = vsel %vm1173_vm5, %v3531_v55, %v1168_v52  ;;  %v1271_v52 = vmul.f32 %v1265_v14, %v3618_v49 }
 0x253   : > { %v1395_v36 = vpop.permute.xlu1 %1394  ;;  %v3601_v45 = vpop.permute.xlu0 %1678 }
 0x254   : > { %v1403_v48 = vsel %vm1400_vm6, %v3553_v1, %v1395_v36 }
 0x257   : > { %v3603_v58 = vpop.permute.xlu1 %1515  ;;  %v3605_v62 = vpop.permute.xlu0 %1780 }
 0x25b   : > { %v3607_v0 = vpop.permute.xlu1 %1897  ;;  %v3609_v4 = vpop.permute.xlu0 %1901 }
 0x25c   : > { %4235 = vst [vmem:[#allocation10_spill] sm:$0xff] %v3607_v0  ;;  %4236 = vst [vmem:[#allocation11_spill] sm:$0xff] %v3609_v4  ;;  %v1270_v4 = vmul.f32 %v1252_v44, %v3623_v21 }
 0x25e   : > { %v1278_v60 = vpack.c.bf16 %v1270_v4, %v1268_v19  ;;  %v1277_v4 = vpack.c.bf16 %v1269_v35, %v3642_v12 }
 0x25f   : > { %v3611_v5 = vpop.permute.xlu1 %1680  ;;  %v1247_v6 = vpop.permute.xlu0 %1246 }
 0x260   : > { %v1266_v10 = vsel %vm1250_vm10, 0.0, %v1247_v6 }
 0x261   : > { %v1273_v16 = vmul.f32 %v1266_v10, %v3618_v49 }
 0x263   : > { %v3616_v27 = vpop.permute.xlu1 %1782  ;;  %v1170_v31 = vpop.permute.xlu0 %1169  ;;  %v1279_v14 = vpack.c.bf16 %v1273_v16, %v1271_v52 }
 0x264   : > { %4237 = vst [vmem:[#allocation12_spill] sm:$0xff] %v3616_v27  ;;  %v1189_v7 = vsel %vm1173_vm5, 0.0, %v1170_v31  ;;  %v1187_v27 = vsel %vm1173_vm5, 0.0, %v3504_v37  ;;  %v1205_v37 = vmul.f32 %v3618_v49, %v1188_v42  ;;  %v1223_v42 = vmul.f32 %v3527_v51, %v1204_v9 }
 0x265   : > { %v1207_v10 = vmul.f32 %v3618_v49, %v1189_v7 }
 0x267   : > { %v3625_v3 = vpop.permute.xlu1 %1903  ;;  %v3627_v2 = vpop.permute.xlu0 %1396 }
 0x268   : > { %4238 = vst [vmem:[#allocation13_spill] sm:$0xff] %v3625_v3  ;;  %v1416_v55 = vsel %vm1400_vm6, 0.0, %v3627_v2 }
 0x269   : > { %v1423_v36 = vmul.f32 %v1416_v55, %v3618_v49 }
 0x26b   : > { %v3637_v11 = vpop.permute.xlu1 %2005  ;;  %v3639_v18 = vpop.permute.xlu0 %2003 }
 0x26c   : > { %4239 = vst [vmem:[#allocation14_spill] sm:$0xff] %v3637_v11  ;;  %4240 = vst [vmem:[#allocation15_spill] sm:$0xff] %v3639_v18  ;;  %v1203_v18 = vmul.f32 %v3618_v49, %v1187_v27 }
 0x26e   : > { %v1222_v12 = vmul.f32 %v3586_v30, %v1203_v18  ;;  %v1417_v18 = vmul.f32 %v3656_v13, %v3618_v49 }
 0x26f   : > { %v1249_v11 = vpop.permute.xlu1 %1248  ;;  %v3676_v3 = vpop.permute.xlu0 %1517 }
 0x270   : > { %v1254_v38 = vsel %vm1250_vm10, %v1247_v6, %v1249_v11  ;;  %v1402_v6 = vsel %vm1400_vm6, %v3508_v40, %v3519_v46  ;;  %v1206_v11 = vmul.f32 %v3623_v21, %v1176_v39  ;;  %v1415_v46 = vsel %vm1400_vm6, 0.0, %v3553_v1 }
 0x271   : > { %v1274_v0 = vmul.f32 %v1254_v38, %v3623_v21  ;;  %v1422_v1 = vmul.f32 %v1403_v48, %v3623_v21  ;;  %v1421_v19 = vmul.f32 %v1415_v46, %v3618_v49 }
 0x272   : > { %v1225_v27 = vmul.f32 %v3527_v51, %v1206_v11 }
 0x273   : > { %v1172_v44 = vpop.permute.xlu1 %1171  ;;  %v3699_v57 = vpop.permute.xlu0 %1899  ;;  %v1280_v38 = vpack.c.bf16 %v1274_v0, %v1272_v47  ;;  %v1414_v0 = vsel %vm1400_vm6, 0.0, %v3508_v40  ;;  %v1226_v47 = vmul.f32 %v3586_v30, %v1207_v10  ;;  %v1224_v40 = vmul.f32 %v3586_v30, %v1205_v37 }
 0x274   : > { %v1177_v7 = vsel %vm1173_vm5, %v1170_v31, %v1172_v44  ;;  %v1420_v31 = vmul.f32 %v1402_v6, %v3623_v21  ;;  %v1799_v10 = vsel %vm1786_vm9, %v3500_v33, 0.0  ;;  %v1419_v35 = vmul.f32 %v1414_v0, %v3618_v49 }
 0x275   : > { %v1208_v39 = vmul.f32 %v3623_v21, %v1177_v7  ;;  %1302 = vmatprep.subr.bf16.mxu0 %v1280_v38  ;;  %v1232_v44 = vpack.c.bf16 %v1226_v47, %v1224_v40  ;;  %v1441_v38 = vmul.f32 %v3541_v59, %v1422_v1  ;;  %v1534_v7 = vsel %vm1521_vm8, 0.0, %v3368_v17 }
 0x276   : > { %1303 = vmatpush1.bf16.msra.mxu0 %v1279_v14  ;;  %v1439_v33 = vmul.f32 %v3541_v59, %v1420_v31  ;;  %v1231_v14 = vpack.c.bf16 %v1223_v42, %v3659_v32  ;;  %v1440_v46 = vmul.f32 %v3533_v56, %v1421_v19  ;;  %v1437_v0 = vmul.f32 %v3541_v59, %v3668_v34 }
 0x277   : > { %v1227_v16 = vmul.f32 %v3527_v51, %v1208_v39  ;;  %v1399_v52 = vpop.permute.xlu1 %1398  ;;  %1304 = vmatprep.subr.bf16.mxu0 %v1278_v60  ;;  %v3726_v11 = vpop.permute.xlu0 %2001  ;;  %v3057_v60 = vld [vmem:[%s4190_s15 + $0x8] sm:$0xff]   ;;  %v1800_v39 = vsel %vm1786_vm9, %v3578_v20, 0.0  ;;  %v1815_v47 = vmul.f32 %v3645_v8, %v1799_v10  ;;  %v1537_v32 = vsel %vm1521_vm8, 0.0, %v3676_v3 }
 0x278   : > { %v1404_v9 = vsel %vm1400_vm6, %v3627_v2, %v1399_v52  ;;  %v1442_v2 = vmul.f32 %v3533_v56, %v1423_v36  ;;  %v1230_v17 = vpack.c.bf16 %v1222_v12, %v3648_v15  ;;  %v1438_v42 = vmul.f32 %v3533_v56, %v1419_v35 }
 0x279   : > { %v1424_v6 = vmul.f32 %v1404_v9, %v3623_v21  ;;  %v1233_v55 = vpack.c.bf16 %v1227_v16, %v1225_v27  ;;  %v1524_v20 = vsel %vm1521_vm8, %v3580_v26, %v3603_v58  ;;  %v4241_v31 = vmov 0   ;;  %v3058_v58 = vld [vmem:[%s4190_s15] sm:$0xff]  }
 0x27a   : > { %1305 = vmatpush1.bf16.msra.mxu0 %v1277_v4  ;;  %v1448_v36 = vpack.c.bf16 %v1442_v2, %v1440_v46  ;;  %v1535_v34 = vsel %vm1521_vm8, 0.0, %v3512_v43  ;;  %v1817_v27 = vmul.f32 %v3645_v8, %v1800_v39  ;;  %v1536_v1 = vsel %vm1521_vm8, 0.0, %v3580_v26 }
 0x27b   : > { %v1443_v37 = vmul.f32 %v3541_v59, %v1424_v6  ;;  %v3737_v48 = vpop.permute.xlu1 %1999  ;;  %1353 = vmatprep.subr.bf16.mxu1 %v1233_v55  ;;  %v3764_v16 = vpop.permute.xlu0 %1893  ;;  %v1447_v52 = vpack.c.bf16 %v1439_v33, %v1437_v0  ;;  %v1436_v4 = vmul.f32 %v3533_v56, %v1417_v18  ;;  %v1544_v40 = vmul.f32 %v1537_v32, %v3586_v30 }
 0x27c   : > { %1354 = vmatpush1.bf16.msra.mxu1 %v1232_v44  ;;  %v1538_v26 = vmul.f32 %v1534_v7, %v3586_v30  ;;  %v3775_v19 = vmul.f32 %v1815_v47, %v3527_v51  ;;  %v1543_v9 = vmul.f32 %v1524_v20, %v3527_v51  ;;  %v1540_v55 = vmul.f32 %v1535_v34, %v3586_v30  ;;  %v3060_v34 = vld [vmem:[%s4190_s15 + $0x18] sm:$0xff]  }
 0x27d   : > { %2940 = vmatmul.mubr.msk.bf16.vlgmr.msra.gmra.mxu0 %vm1286_vm11, %v3057_v60  ;;  %1355 = vmatprep.subr.bf16.mxu1 %v1231_v14  ;;  %v1449_v13 = vpack.c.bf16 %v1443_v37, %v1441_v38  ;;  %v1446_v6 = vpack.c.bf16 %v1438_v42, %v1436_v4  ;;  %v1542_v60 = vmul.f32 %v1536_v1, %v3586_v30  ;;  %v1801_v44 = vsel %vm1786_vm9, %v3605_v62, 0.0  ;;  %v3059_v38 = vld [vmem:[%s4190_s15 + $0x10] sm:$0xff]  }
 0x27e   : > { %1490 = vmatprep.mubr.bf16.mxu0 %v4241_v31  ;;  %v3784_v12 = vmul.f32 %v1817_v27, %v3527_v51  ;;  %v1789_v35 = vsel %vm1786_vm9, %v3599_v53, %v3605_v62  ;;  %v1609_v53 = vpack.c.bf16 %v3378_v22, %v3321_v50  ;;  %v1610_v7 = vpack.c.bf16 %v3388_v23, %v3325_v54  ;;  %v4242_v54 = vld [vmem:[#allocation3_spill] sm:$0xff] }
 0x27f   : > { %v1520_v15 = vpop.permute.xlu1 %1519  ;;  %1470 = vmatprep.subr.bf16.mxu0 %v1449_v13  ;;  %v3801_v62 = vpop.permute.xlu0 %1995  ;;  %v1687_v46 = vsel %vm1684_vm7, %v3595_v41, %v3601_v45  ;;  %v1818_v39 = vmul.f32 %v3551_v63, %v1789_v35  ;;  %v1819_v50 = vmul.f32 %v3645_v8, %v1801_v44  ;;  %v1611_v22 = vpack.c.bf16 %v3390_v24, %v3402_v28  ;;  %v4245_v24 = vld [vmem:[#allocation12_spill] sm:$0xff] }
 0x280   : > { %v1525_v43 = vsel %vm1521_vm8, %v3676_v3, %v1520_v15  ;;  %1356 = vmatpush1.bf16.msra.mxu1 %v1230_v17  ;;  %1471 = vmatpush1.bf16.msra.mxu0 %v1448_v36  ;;  %v1612_v3 = vpack.c.bf16 %v3396_v25, %v3420_v29  ;;  %v1699_v25 = vsel %vm1684_vm7, %v3601_v45, 0.0  ;;  %v1550_v29 = vpack.c.bf16 %v1544_v40, %v1542_v60  ;;  %v4244_v45 = vld [vmem:[#allocation15_spill] sm:$0xff]  ;;  %v4246_v15 = vld [vmem:[#allocation10_spill] sm:$0xff] }
 0x281   : > { %v1545_v10 = vmul.f32 %v1525_v43, %v3527_v51  ;;  %1472 = vmatprep.subr.bf16.mxu0 %v1447_v52  ;;  %v1706_v0 = vmul.f32 %v1699_v25, %v3541_v59  ;;  %v4243_v23 = vpack.c.bf16 %v3547_v61, %v4242_v54  ;;  %v1833_v41 = vpack.c.bf16 %v3784_v12, %v3775_v19  ;;  %v4252_v54 = vld [vmem:[#allocation14_spill] sm:$0xff] }
 0x282   : > { %v2024_v32 = vsel %vm2009_vm12, %v4244_v45, 0.0  ;;  %v1705_v42 = vmul.f32 %v1687_v46, %v3533_v56  ;;  %v1826_v27 = vmul.f32 %v1818_v39, %v3586_v30  ;;  %v1827_v1 = vmul.f32 %v1819_v50, %v3527_v51  ;;  %v4249_v50 = vld [vmem:[#allocation7_spill] sm:$0xff] }
 0x283   : > { %v1683_v2 = vpop.permute.xlu1 %1682  ;;  %2942 = vmatmul.mubr.msk.bf16.vlgmr.msra.gmra.mxu1 %vm1286_vm11, %v3058_v58  ;;  %v1551_v33 = vpack.c.bf16 %v1545_v10, %v1543_v9  ;;  %v1921_v52 = vsel %vm1907_vm13, %v4246_v15, 0.0  ;;  %v4247_v58 = vld [vmem:[#allocation11_spill] sm:$0xff]  ;;  %v2031_v40 = vmul.f32 %v2024_v32, %v3645_v8  ;;  %v2012_v43 = vsel %vm2009_vm12, %v3726_v11, %v4244_v45 }
 0x284   : > { %v1700_v37 = vsel %vm1684_vm7, %v1683_v2, 0.0  ;;  %1473 = vmatpush1.bf16.msra.mxu0 %v1446_v6  ;;  %1592 = vmatprep.mubr.bf16.mxu1 %v4241_v31  ;;  %v1688_v14 = vsel %vm1684_vm7, %v3611_v5, %v1683_v2  ;;  %v1548_v5 = vpack.c.bf16 %v1540_v55, %v1538_v26  ;;  %v1922_v4 = vsel %vm1907_vm13, %v4247_v58, 0.0  ;;  %v1892_v26 = vpop.permute.xlu0 %1891  ;;  %v3061_v55 = vld [vmem:[%s4190_s15 + $0x20] sm:$0xff]   ;;  %v4248_v2 = vld [vmem:[#allocation13_spill] sm:$0xff] }
 0x285   : > { %v1708_v18 = vmul.f32 %v1700_v37, %v3541_v59  ;;  %1572 = vmatprep.subr.bf16.mxu1 %v1551_v33  ;;  %1633 = vmatprep.subr.bf16.mxu0 %v1612_v3  ;;  %v1707_v13 = vmul.f32 %v1688_v14, %v3533_v56  ;;  %v1920_v60 = vsel %vm1907_vm13, %v3764_v16, 0.0  ;;  %v2022_v3 = vsel %vm2009_vm12, %v3801_v62, 0.0 }
 0x286   : > { %1573 = vmatpush1.bf16.msra.mxu1 %v1550_v29  ;;  %v1927_v29 = vmul.f32 %v1921_v52, %v3645_v8  ;;  %v1929_v37 = vmul.f32 %v1922_v4, %v3645_v8  ;;  %v2030_v14 = vmul.f32 %v2012_v43, %v3551_v63  ;;  %v2027_v46 = vmul.f32 %v2022_v3, %v3645_v8 }
 0x287   : > { %v1785_v47 = vpop.permute.xlu1 %1784  ;;  %2944 = vmatmul.mubr.msk.bf16.vlgmr.msra.gmra.mxu0 %vm1286_vm11, %v3059_v38  ;;  %1574 = vmatprep.subr.bf16.mxu1 %v4243_v23  ;;  %v1714_v36 = vpack.c.bf16 %v1708_v18, %v1706_v0  ;;  %v1713_v35 = vpack.c.bf16 %v1707_v13, %v1705_v42  ;;  %v2023_v18 = vsel %vm2009_vm12, %v3737_v48, 0.0  ;;  %v2039_v0 = vmul.f32 %v2031_v40, %v3541_v59 }
 0x288   : > { %v1790_v28 = vsel %vm1786_vm9, %v4245_v24, %v1785_v47  ;;  %v1802_v17 = vsel %vm1786_vm9, %v1785_v47, 0.0  ;;  %1634 = vmatpush1.bf16.msra.mxu0 %v1611_v22  ;;  %1653 = vmatprep.mubr.bf16.mxu0 %v4241_v31  ;;  %v4250_v22 = vld [vmem:[#allocation5_spill] sm:$0xff]  ;;  %v1908_v45 = vsel %vm1907_vm13, %v1892_v26, %v3764_v16  ;;  %v1994_v32 = vpop.permute.xlu0 %1993  ;;  %v4253_v16 = vld [vmem:[#allocation6_spill] sm:$0xff] }
 0x289   : > { %v1820_v61 = vmul.f32 %v3551_v63, %v1790_v28  ;;  %v1821_v20 = vmul.f32 %v3645_v8, %v1802_v17  ;;  %1635 = vmatprep.subr.bf16.mxu0 %v1610_v7  ;;  %v1925_v7 = vmul.f32 %v1920_v60, %v3645_v8  ;;  %v3062_v17 = vld [vmem:[%s4190_s15 + $0x28] sm:$0xff]   ;;  %v1924_v40 = vmul.f32 %v1908_v45, %v3551_v63 }
 0x28a   : > { %1575 = vmatpush1.bf16.msra.mxu1 %v1548_v5  ;;  %v4251_v5 = vpack.c.bf16 %v4249_v50, %v4250_v22  ;;  %v2010_v43 = vsel %vm2009_vm12, %v1994_v32, %v3801_v62 }
 0x28b   : > { %v1828_v9 = vmul.f32 %v1820_v61, %v3586_v30  ;;  %v1829_v10 = vmul.f32 %v1821_v20, %v3527_v51  ;;  %v1906_v6 = vpop.permute.xlu1 %1905  ;;  %1735 = vmatprep.subr.bf16.mxu1 %v1714_v36  ;;  %v2038_v61 = vmul.f32 %v2030_v14, %v3533_v56  ;;  %v2029_v20 = vmul.f32 %v2023_v18, %v3645_v8  ;;  %v4254_v36 = vld [vmem:[#allocation4_spill] sm:$0xff] }
 0x28c   : > { %v1923_v11 = vsel %vm1907_vm13, %v1906_v6, 0.0  ;;  %1636 = vmatpush1.bf16.msra.mxu0 %v1609_v53  ;;  %v1911_v33 = vsel %vm1907_vm13, %v4248_v2, %v1906_v6  ;;  %v1910_v53 = vsel %vm1907_vm13, %v3699_v57, %v4247_v58  ;;  %v1935_v4 = vpack.c.bf16 %v1927_v29, %v1925_v7  ;;  %v4257_v6 = vld [vmem:[#allocation8_spill] sm:$0xff] }
 0x28d   : > { %v1834_v44 = vpack.c.bf16 %v1828_v9, %v1826_v27  ;;  %v1931_v38 = vmul.f32 %v1923_v11, %v3645_v8  ;;  %2946 = vmatmul.mubr.msk.bf16.vlgmr.msra.gmra.mxu1 %vm1286_vm11, %v3060_v34  ;;  %v1835_v25 = vpack.c.bf16 %v1829_v10, %v1827_v1  ;;  %v1930_v47 = vmul.f32 %v1911_v33, %v3551_v63  ;;  %v4256_v10 = vld [vmem:[#allocation9_spill] sm:$0xff]  ;;  %v3064_v33 = vld [vmem:[%s4190_s15 + $0x38] sm:$0xff]  }
 0x28e   : > { %1736 = vmatpush1.bf16.msra.mxu1 %v1713_v35  ;;  %1755 = vmatprep.mubr.bf16.mxu1 %v4241_v31  ;;  %v1928_v42 = vmul.f32 %v1910_v53, %v3551_v63  ;;  %v4255_v34 = vpack.c.bf16 %v4253_v16, %v4254_v36  ;;  %v2035_v27 = vmul.f32 %v2027_v46, %v3541_v59 }
 0x28f   : > { %v2008_v39 = vpop.permute.xlu1 %2007  ;;  %2948 = vmatmul.mubr.msk.bf16.vlgmr.msra.gmra.mxu0 %vm1286_vm11, %v3061_v55  ;;  %1737 = vmatprep.subr.bf16.mxu1 %v4251_v5  ;;  %v1937_v28 = vpack.c.bf16 %v1931_v38, %v1929_v37  ;;  %v4258_v55 = vpack.c.bf16 %v4256_v10, %v4257_v6  ;;  %v2037_v62 = vmul.f32 %v2029_v20, %v3541_v59 }
 0x290   : > { %v2013_v57 = vsel %vm2009_vm12, %v4252_v54, %v2008_v39  ;;  %v2025_v23 = vsel %vm2009_vm12, %v2008_v39, 0.0  ;;  %1856 = vmatprep.subr.bf16.mxu0 %v1835_v25  ;;  %1876 = vmatprep.mubr.bf16.mxu0 %v4241_v31  ;;  %v1936_v19 = vpack.c.bf16 %v1930_v47, %v1928_v42 }
 0x291   : > { %v2032_v13 = vmul.f32 %v2013_v57, %v3551_v63  ;;  %v2033_v24 = vmul.f32 %v2025_v23, %v3645_v8  ;;  %1857 = vmatpush1.bf16.msra.mxu0 %v1834_v44  ;;  %v2045_v44 = vpack.c.bf16 %v2037_v62, %v2035_v27 }
 0x292   : > { %1858 = vmatprep.subr.bf16.mxu0 %v1833_v41  ;;  %1738 = vmatpush1.bf16.msra.mxu1 %v4255_v34  ;;  %v3063_v41 = vld [vmem:[%s4190_s15 + $0x30] sm:$0xff]  }
 0x293   : > { %v2040_v1 = vmul.f32 %v2032_v13, %v3533_v56  ;;  %v2041_v52 = vmul.f32 %v2033_v24, %v3541_v59  ;;  %v1896_v58 = vpop.permute.xlu1 %1895  ;;  %1958 = vmatprep.subr.bf16.mxu1 %v1937_v28 }
 0x294   : > { %v1909_v12 = vsel %vm1907_vm13, %v1896_v58, %v4246_v15  ;;  %v2026_v15 = vmul.f32 %v2010_v43, %v3551_v63 }
 0x295   : > { %v2046_v26 = vpack.c.bf16 %v2040_v1, %v2038_v61  ;;  %v1926_v9 = vmul.f32 %v1909_v12, %v3551_v63  ;;  %1859 = vmatpush1.bf16.msra.mxu0 %v4258_v55  ;;  %2950 = vmatmul.mubr.msk.bf16.vlgmr.msra.gmra.mxu1 %vm1286_vm11, %v3062_v17  ;;  %v2047_v60 = vpack.c.bf16 %v2041_v52, %v2039_v0 }
 0x296   : > { %1959 = vmatpush1.bf16.msra.mxu1 %v1936_v19  ;;  %1978 = vmatprep.mubr.bf16.mxu1 %v4241_v31  ;;  %v2034_v38 = vmul.f32 %v2026_v15, %v3533_v56 }
 0x297   : > { %v1934_v3 = vpack.c.bf16 %v1926_v9, %v1924_v40  ;;  %v1998_v35 = vpop.permute.xlu1 %1997  ;;  %1960 = vmatprep.subr.bf16.mxu1 %v1935_v4  ;;  %2068 = vmatprep.subr.bf16.mxu0 %v2047_v60 }
 0x298   : > { %v2011_v11 = vsel %vm2009_vm12, %v1998_v35, %v3737_v48  ;;  %2952 = vmatmul.mubr.msk.bf16.vlgmr.msra.gmra.mxu0 %vm1286_vm11, %v3063_v41  ;;  %v3065_v48 = vld [vmem:[%s4190_s15 + $0x40] sm:$0xff]  }
 0x299   : > { %v2028_v2 = vmul.f32 %v2011_v11, %v3551_v63  ;;  %2069 = vmatpush1.bf16.msra.mxu0 %v2046_v26  ;;  %2088 = vmatprep.mubr.bf16.mxu0 %v4241_v31 }
 0x29a   : > { %2070 = vmatprep.subr.bf16.mxu0 %v2045_v44  ;;  %1961 = vmatpush1.bf16.msra.mxu1 %v1934_v3 }
 0x29b   : > { %v2036_v25 = vmul.f32 %v2028_v2, %v3533_v56 }
 0x29d   : > { %v2044_v29 = vpack.c.bf16 %v2036_v25, %v2034_v38  ;;  %2954 = vmatmul.mubr.msk.bf16.vlgmr.msra.gmra.mxu1 %vm1286_vm11, %v3064_v33 }
 0x29e   : > { %2212 = vmatprep.mubr.bf16.mxu1 %v4241_v31 }
 0x29f   : > { %2071 = vmatpush1.bf16.msra.mxu0 %v2044_v29 }
 0x2a2   : > { %2956 = vmatmul.mubr.msk.bf16.vlgmr.msra.gmra.mxu0 %vm1286_vm11, %v3065_v48 }
 0x2a3   : > { %2256 = vmatprep.mubr.bf16.mxu0 %v4241_v31 }
 0x33d   : > { %v1324_v37 = vpop.f32.mrf.mxu0 }
 0x33f   : > { %v1326_v14 = vpop.f32.mrf.mxu0 }
 0x341   : > { %v1328_v53 = vpop.f32.mrf.mxu0 }
 0x343   : > { %v1375_v18 = vpop.f32.mrf.mxu1  ;;  %v1330_v7 = vpop.f32.mrf.mxu0 }
 0x344   : > { %v1376_v45 = vadd.f32 %v1375_v18, %v1324_v37  ;;  %v2108_v37 = vpop.permute.xlu0 %2107 }
 0x345   : > { %v1377_v46 = vpop.f32.mrf.mxu1 }
 0x346   : > { %v1378_v24 = vadd.f32 %v1377_v46, %v1326_v14 }
 0x347   : > { %v1379_v39 = vpop.f32.mrf.mxu1  ;;  %v1492_v50 = vpop.f32.mrf.mxu0 }
 0x348   : > { %v1501_v28 = vadd.f32 %v1492_v50, %v1376_v45  ;;  %v1380_v61 = vadd.f32 %v1379_v39, %v1328_v53  ;;  %v2113_v45 = vpop.permute.xlu1 %2112 }
 0x349   : > { %v1494_v22 = vpop.f32.mrf.mxu0  ;;  %v1381_v5 = vpop.f32.mrf.mxu1 }
 0x34a   : > { %v1502_v20 = vadd.f32 %v1494_v22, %v1378_v24  ;;  %v1382_v27 = vadd.f32 %v1381_v5, %v1330_v7 }
 0x34b   : > { %v1496_v0 = vpop.f32.mrf.mxu0 }
 0x34c   : > { %v1503_v1 = vadd.f32 %v1496_v0, %v1380_v61 }
 0x34d   : > { %v1498_v47 = vpop.f32.mrf.mxu0  ;;  %v1594_v54 = vpop.f32.mrf.mxu1 }
 0x34e   : > { %v1603_v16 = vadd.f32 %v1594_v54, %v1501_v28  ;;  %v1504_v40 = vadd.f32 %v1498_v47, %v1382_v27 }
 0x34f   : > { %v1596_v57 = vpop.f32.mrf.mxu1  ;;  %v1655_v23 = vpop.f32.mrf.mxu0 }
 0x350   : > { %v1604_v52 = vadd.f32 %v1596_v57, %v1502_v20  ;;  %v1664_v43 = vadd.f32 %v1655_v23, %v1603_v16 }
 0x351   : > { %v1598_v32 = vpop.f32.mrf.mxu1  ;;  %v1657_v13 = vpop.f32.mrf.mxu0 }
 0x352   : > { %v1605_v19 = vadd.f32 %v1598_v32, %v1503_v1  ;;  %v1665_v26 = vadd.f32 %v1657_v13, %v1604_v52 }
 0x353   : > { %v1600_v17 = vpop.f32.mrf.mxu1  ;;  %v1659_v42 = vpop.f32.mrf.mxu0 }
 0x354   : > { %v1606_v9 = vadd.f32 %v1600_v17, %v1504_v40  ;;  %v1666_v60 = vadd.f32 %v1659_v42, %v1605_v19 }
 0x355   : > { %v1661_v36 = vpop.f32.mrf.mxu0  ;;  %v1757_v34 = vpop.f32.mrf.mxu1 }
 0x356   : > { %v1766_v10 = vadd.f32 %v1757_v34, %v1664_v43  ;;  %v1667_v3 = vadd.f32 %v1661_v36, %v1606_v9  ;;  %v2740_v36 = vld [vmem:[%s4193_s18] sm:$0xff] }
 0x357   : > { %v1759_v58 = vpop.f32.mrf.mxu1  ;;  %v2753_v34 = vld [vmem:[%s4195_s20] sm:$0xff] }
 0x358   : > { %v1878_v4 = vpop.f32.mrf.mxu0  ;;  %v1767_v62 = vadd.f32 %v1759_v58, %v1665_v26 }
 0x359   : > { %v1761_v12 = vpop.f32.mrf.mxu1  ;;  %v1887_v35 = vadd.f32 %v1878_v4, %v1766_v10 }
 0x35a   : > { %v1880_v41 = vpop.f32.mrf.mxu0  ;;  %v1768_v11 = vadd.f32 %v1761_v12, %v1666_v60 }
 0x35b   : > { %v1763_v6 = vpop.f32.mrf.mxu1  ;;  %v1888_v33 = vadd.f32 %v1880_v41, %v1767_v62 }
 0x35c   : > { %v1882_v55 = vpop.f32.mrf.mxu0  ;;  %v1769_v38 = vadd.f32 %v1763_v6, %v1667_v3 }
 0x35d   : > { %v1980_v15 = vpop.f32.mrf.mxu1  ;;  %v1889_v14 = vadd.f32 %v1882_v55, %v1768_v11 }
 0x35e   : > { %v1884_v2 = vpop.f32.mrf.mxu0  ;;  %v1989_v25 = vadd.f32 %v1980_v15, %v1887_v35 }
 0x35f   : > { %v1982_v44 = vpop.f32.mrf.mxu1  ;;  %v1890_v39 = vadd.f32 %v1884_v2, %v1769_v38 }
 0x360   : > { %v1990_v53 = vadd.f32 %v1982_v44, %v1888_v33 }
 0x361   : > { %v1984_v29 = vpop.f32.mrf.mxu1 }
 0x362   : > { %v2090_v48 = vpop.f32.mrf.mxu0  ;;  %v1991_v50 = vadd.f32 %v1984_v29, %v1889_v14 }
 0x363   : > { %v2099_v18 = vadd.f32 %v2090_v48, %v1989_v25  ;;  %v1986_v7 = vpop.f32.mrf.mxu1 }
 0x364   : > { %v2092_v46 = vpop.f32.mrf.mxu0  ;;  %v1992_v54 = vadd.f32 %v1986_v7, %v1890_v39 }
 0x365   : > { %v2115_v22 = vadd.f32 %v2108_v37, %v2099_v18  ;;  %v2100_v5 = vadd.f32 %v2092_v46, %v1990_v53 }
 0x366   : > { %v2094_v0 = vpop.f32.mrf.mxu0 }
 0x367   : > { %v3932_v47 = vmax.f32 %v2115_v22, 0.0  ;;  %v2116_v57 = vadd.f32 %v2108_v37, %v2100_v5  ;;  %v2101_v23 = vadd.f32 %v2094_v0, %v1991_v50 }
 0x368   : > { %v2096_v32 = vpop.f32.mrf.mxu0 }
 0x369   : > { %v3934_v13 = vmax.f32 %v2116_v57, 0.0  ;;  %v2117_v24 = vadd.f32 %v2113_v45, %v2101_v23  ;;  %v2102_v28 = vadd.f32 %v2096_v32, %v1992_v54  ;;  %2154 = vrot.lane.b32.xlu0 %v3932_v47, %s3077_s24  ;;  %v2174_v54 = vld [vmem:[%s4192_s17 + $0x4] sm:$0xf] }
 0x36b   : > { %v3938_v17 = vmax.f32 %v2117_v24, 0.0  ;;  %v2118_v42 = vadd.f32 %v2113_v45, %v2102_v28  ;;  %2156 = vrot.lane.b32.xlu1 %v3934_v13, %s3077_s24 }
 0x36d   : > { %v3942_v61 = vmax.f32 %v2118_v42, 0.0  ;;  %2127 = vrot.lane.b32.xlu0 %v3932_v47, %s3078_s26  ;;  %v2408_v20 = vpack.c.bf16 %v3938_v17, %v3932_v47 }
 0x36f   : > { %2129 = vrot.lane.b32.xlu1 %v3934_v13, %s3078_s26  ;;  %v2409_v16 = vpack.c.bf16 %v3942_v61, %v3934_v13 }
 0x371   : > { %2265 = vrot.lane.b32.xlu0 %v3932_v47, %s3079_s27 }
 0x373   : > { %2267 = vrot.lane.b32.xlu1 %v3934_v13, %s3079_s27 }
 0x375   : > { %2338 = vrot.lane.b32.xlu0 %v3932_v47, %s3080_s3 }
 0x377   : > { %2340 = vrot.lane.b32.xlu1 %v3934_v13, %s3080_s3 }
 0x379   : > { %2458 = vrot.lane.b32.xlu0 %v3934_v13, %s3081_s28 }
 0x37b   : > { %2460 = vrot.lane.b32.xlu1 %v3938_v17, %s3081_s28 }
 0x37d   : > { %2527 = vrot.lane.b32.xlu0 %v3934_v13, %s3082_s4 }
 0x37f   : > { %2529 = vrot.lane.b32.xlu1 %v3938_v17, %s3082_s4 }
 0x381   : > { %2158 = vrot.lane.b32.xlu0 %v3938_v17, %s3077_s24 }
 0x383   : > { %2160 = vrot.lane.b32.xlu1 %v3942_v61, %s3077_s24 }
 0x385   : > { %2131 = vrot.lane.b32.xlu0 %v3938_v17, %s3078_s26 }
 0x387   : > { %2133 = vrot.lane.b32.xlu1 %v3942_v61, %s3078_s26 }
 0x389   : > { %2269 = vrot.lane.b32.xlu0 %v3938_v17, %s3079_s27 }
 0x38b   : > { %2271 = vrot.lane.b32.xlu1 %v3942_v61, %s3079_s27 }
 0x38d   : > { %2456 = vrot.lane.b32.xlu0 %v3932_v47, %s3081_s28 }
 0x38f   : > { %2602 = vrot.lane.b32.xlu1 %v3938_v17, %s3083_s30 }
 0x391   : > { %2342 = vrot.lane.b32.xlu0 %v3938_v17, %s3080_s3 }
 0x393   : > { %2344 = vrot.lane.b32.xlu1 %v3942_v61, %s3080_s3 }
 0x395   : > { %2525 = vrot.lane.b32.xlu0 %v3932_v47, %s3082_s4 }
 0x397   : > { %2462 = vrot.lane.b32.xlu1 %v3942_v61, %s3081_s28 }
 0x399   : > { %2600 = vrot.lane.b32.xlu0 %v3934_v13, %s3083_s30 }
 0x39b   : > { %2531 = vrot.lane.b32.xlu1 %v3942_v61, %s3082_s4 }
 0x39d   : > { %2669 = vrot.lane.b32.xlu0 %v3934_v13, %s3084_s5 }
 0x39f   : > { %2604 = vrot.lane.b32.xlu1 %v3942_v61, %s3083_s30 }
 0x3a1   : > { %2598 = vrot.lane.b32.xlu0 %v3932_v47, %s3083_s30 }
 0x3a3   : > { %2673 = vrot.lane.b32.xlu1 %v3942_v61, %s3084_s5 }
 0x3a5   : > { %2667 = vrot.lane.b32.xlu0 %v3932_v47, %s3084_s5 }
 0x3a7   : > { %2671 = vrot.lane.b32.xlu1 %v3938_v17, %s3084_s5  ;;  %s2971_s5 = sshll.u32 %s4262_s25, 4 }
 0x3a8   : > { %s696_s23 = scalar_lea.vmem %s4259_s22, %s2971_s5 }
 0x3a9   : > { %2743 = vperm.xlu0 %3020, %v2740_v36  }
 0x3ab   : > { %2756 = vperm.xlu1 %3021, %v2753_v34  }
 0x3db   : > { %v2155_v27 = vpop.permute.xlu0 %2154 }
 0x3dc   : > { %v2168_v60 = vsel %vm1250_vm10, 0.0, %v2155_v27 }
 0x3dd   : > { %v2157_v1 = vpop.permute.xlu1 %2156  ;;  %v2170_v38 = vmul.f32 %v2168_v60, %v3618_v49 }
 0x3de   : > { %v2162_v6 = vsel %vm1250_vm10, %v2155_v27, %v2157_v1 }
 0x3df   : > { %v2128_v52 = vpop.permute.xlu0 %2127  ;;  %v2171_v11 = vmul.f32 %v2162_v6, %v3623_v21 }
 0x3e0   : > { %v2141_v44 = vsel %vm1173_vm5, 0.0, %v2128_v52 }
 0x3e1   : > { %v2130_v58 = vpop.permute.xlu1 %2129  ;;  %v2143_v53 = vmul.f32 %v2141_v44, %v3618_v49 }
 0x3e2   : > { %v2135_v15 = vsel %vm1173_vm5, %v2128_v52, %v2130_v58 }
 0x3e3   : > { %v2266_v4 = vpop.permute.xlu0 %2265  ;;  %v2144_v29 = vmul.f32 %v2135_v15, %v3623_v21  ;;  %v2147_v28 = vmul.f32 %v2143_v53, %v3586_v30 }
 0x3e4   : > { %v2279_v39 = vsel %vm1400_vm6, 0.0, %v2266_v4 }
 0x3e5   : > { %v2268_v40 = vpop.permute.xlu1 %2267  ;;  %v2148_v57 = vmul.f32 %v2144_v29, %v3527_v51  ;;  %v2281_v42 = vmul.f32 %v2279_v39, %v3618_v49 }
 0x3e6   : > { %v2273_v18 = vsel %vm1400_vm6, %v2266_v4, %v2268_v40 }
 0x3e7   : > { %v4014_v43 = vpop.permute.xlu0 %2338  ;;  %v2282_v23 = vmul.f32 %v2273_v18, %v3623_v21 }
 0x3e9   : > { %v2341_v19 = vpop.permute.xlu1 %2340  ;;  %v2286_v4 = vmul.f32 %v2282_v23, %v3541_v59 }
 0x3ea   : > { %v2346_v60 = vsel %vm1521_vm8, %v4014_v43, %v2341_v19  ;;  %v2289_v19 = vld [vmem:[%s4192_s17 + $0x8] sm:$0xf] }
 0x3eb   : > { %v4016_v12 = vpop.permute.xlu0 %2458 }
 0x3ed   : > { %v4018_v41 = vpop.permute.xlu1 %2460 }
 0x3ef   : > { %v4020_v26 = vpop.permute.xlu0 %2527 }
 0x3f0   : > { %v2539_v61 = vsel %vm1786_vm9, %v4020_v26, 0.0 }
 0x3f1   : > { %v4022_v9 = vpop.permute.xlu1 %2529 }
 0x3f3   : > { %v2159_v10 = vpop.permute.xlu0 %2158 }
 0x3f4   : > { %v2169_v55 = vsel %vm1250_vm10, 0.0, %v2159_v10 }
 0x3f5   : > { %v2161_v62 = vpop.permute.xlu1 %2160  ;;  %v2172_v3 = vmul.f32 %v2169_v55, %v3618_v49 }
 0x3f6   : > { %v2163_v35 = vsel %vm1250_vm10, %v2159_v10, %v2161_v62 }
 0x3f7   : > { %v2173_v2 = vmul.f32 %v2163_v35, %v3623_v21  ;;  %v2132_v33 = vpop.permute.xlu0 %2131  ;;  %v2175_v7 = vpack.c.bf16 %v2172_v3, %v2170_v38  ;;  %v2352_v3 = vsel %vm1521_vm8, 0.0, %v4014_v43  ;;  %v2355_v43 = vmul.f32 %v2346_v60, %v3527_v51 }
 0x3f8   : > { %v2142_v25 = vsel %vm1173_vm5, 0.0, %v2132_v33 }
 0x3f9   : > { %v2145_v48 = vmul.f32 %v2142_v25, %v3618_v49  ;;  %v2134_v37 = vpop.permute.xlu1 %2133  ;;  %v2176_v14 = vpack.c.bf16 %v2173_v2, %v2171_v11  ;;  %v2470_v11 = vsel %vm1684_vm7, %v4016_v12, 0.0  ;;  %v2354_v25 = vmul.f32 %v2352_v3, %v3586_v30 }
 0x3fa   : > { %v2136_v46 = vsel %vm1173_vm5, %v2132_v33, %v2134_v37 }
 0x3fb   : > { %v2146_v50 = vmul.f32 %v2136_v46, %v3623_v21  ;;  %v2270_v22 = vpop.permute.xlu0 %2269  ;;  %2194 = vmatprep.subr.bf16.mxu1 %v2176_v14  ;;  %v2149_v5 = vmul.f32 %v2145_v48, %v3586_v30  ;;  %v2473_v48 = vmul.f32 %v2470_v11, %v3541_v59 }
 0x3fc   : > { %v2280_v0 = vsel %vm1400_vm6, 0.0, %v2270_v22  ;;  %2195 = vmatpush1.bf16.msra.mxu1 %v2175_v7 }
 0x3fd   : > { %v2150_v45 = vmul.f32 %v2146_v50, %v3527_v51  ;;  %v2283_v32 = vmul.f32 %v2280_v0, %v3618_v49  ;;  %v2272_v24 = vpop.permute.xlu1 %2271  ;;  %v2152_v52 = vpack.c.bf16 %v2149_v5, %v2147_v28  ;;  %v2285_v49 = vmul.f32 %v2281_v42, %v3533_v56  ;;  %v2407_v0 = vld [vmem:[%s4192_s17 + $0x10] sm:$0xf] }
 0x3fe   : > { %v2274_v36 = vsel %vm1400_vm6, %v2270_v22, %v2272_v24 }
 0x3ff   : > { %v2284_v34 = vmul.f32 %v2274_v36, %v3623_v21  ;;  %v2457_v27 = vpop.permute.xlu0 %2456  ;;  %2957 = vmatmul.mubr.msk.bf16.vlgmr.msra.gmra.mxu1 %vm1250_vm10, %v2174_v54  ;;  %v2153_v1 = vpack.c.bf16 %v2150_v45, %v2148_v57  ;;  %v2287_v58 = vmul.f32 %v2283_v32, %v3533_v56  ;;  %v2151_v21 = vld [vmem:[%s4192_s17] sm:$0xf] }
 0x400   : > { %2327 = vmatprep.mubr.bf16.mxu1 %v4241_v31  ;;  %v2464_v29 = vsel %vm1684_vm7, %v2457_v27, %v4016_v12 }
 0x401   : > { %v2288_v40 = vmul.f32 %v2284_v34, %v3541_v59  ;;  %2238 = vmatprep.subr.bf16.mxu0 %v2153_v1  ;;  %v4060_v10 = vpop.permute.xlu1 %2602  ;;  %v2290_v62 = vpack.c.bf16 %v2287_v58, %v2285_v49 }
 0x402   : > { %2239 = vmatpush1.bf16.msra.mxu0 %v2152_v52 }
 0x403   : > { %v2343_v6 = vpop.permute.xlu0 %2342  ;;  %v2291_v55 = vpack.c.bf16 %v2288_v40, %v2286_v4 }
 0x404   : > { %v2353_v15 = vsel %vm1521_vm8, 0.0, %v2343_v6 }
 0x405   : > { %2958 = vmatmul.mubr.msk.bf16.vlgmr.msra.gmra.mxu0 %vm1250_vm10, %v2151_v21  ;;  %2309 = vmatprep.subr.bf16.mxu1 %v2291_v55  ;;  %v2345_v35 = vpop.permute.xlu1 %2344  ;;  %v2356_v44 = vmul.f32 %v2353_v15, %v3586_v30 }
 0x406   : > { %v2347_v2 = vsel %vm1521_vm8, %v2343_v6, %v2345_v35  ;;  %2310 = vmatpush1.bf16.msra.mxu1 %v2290_v62  ;;  %2396 = vmatprep.mubr.bf16.mxu0 %v4241_v31  ;;  %v2549_v35 = vld [vmem:[%s4192_s17 + $0x18] sm:$0xf] }
 0x407   : > { %v2357_v33 = vmul.f32 %v2347_v2, %v3527_v51  ;;  %v2526_v38 = vpop.permute.xlu0 %2525  ;;  %2427 = vmatprep.subr.bf16.mxu1 %v2409_v16  ;;  %v2359_v53 = vpack.c.bf16 %v2356_v44, %v2354_v25  ;;  %v2472_v16 = vmul.f32 %v2464_v29, %v3533_v56  ;;  %v2618_v25 = vld [vmem:[%s4192_s17 + $0x1c] sm:$0xf] }
 0x408   : > { %v2533_v18 = vsel %vm1786_vm9, %v2526_v38, %v4020_v26  ;;  %v2542_v26 = vmul.f32 %v2539_v61, %v3645_v8 }
 0x409   : > { %2959 = vmatmul.mubr.msk.bf16.vlgmr.msra.gmra.mxu1 %vm1250_vm10, %v2289_v19  ;;  %v2463_v37 = vpop.permute.xlu1 %2462  ;;  %v2360_v14 = vpack.c.bf16 %v2357_v33, %v2355_v43  ;;  %v2541_v47 = vmul.f32 %v2533_v18, %v3551_v63 }
 0x40a   : > { %v2465_v7 = vsel %vm1684_vm7, %v4018_v41, %v2463_v37  ;;  %v2471_v13 = vsel %vm1684_vm7, %v2463_v37, 0.0  ;;  %2428 = vmatpush1.bf16.msra.mxu1 %v2408_v20  ;;  %2445 = vmatprep.mubr.bf16.mxu1 %v4241_v31  ;;  %v2358_v41 = vld [vmem:[%s4192_s17 + $0xc] sm:$0xf]  ;;  %v2546_v42 = vmul.f32 %v2542_v26, %v3527_v51 }
 0x40b   : > { %v2474_v12 = vmul.f32 %v2465_v7, %v3533_v56  ;;  %v2475_v46 = vmul.f32 %v2471_v13, %v3541_v59  ;;  %v2601_v39 = vpop.permute.xlu0 %2600  ;;  %2378 = vmatprep.subr.bf16.mxu0 %v2360_v14 }
 0x40c   : > { %2379 = vmatpush1.bf16.msra.mxu0 %v2359_v53  ;;  %v2612_v45 = vsel %vm1907_vm13, %v2601_v39, 0.0 }
 0x40d   : > { %v2477_v17 = vpack.c.bf16 %v2474_v12, %v2472_v16  ;;  %v2532_v20 = vpop.permute.xlu1 %2531  ;;  %v2478_v50 = vpack.c.bf16 %v2475_v46, %v2473_v48  ;;  %v2615_v1 = vmul.f32 %v2612_v45, %v3645_v8 }
 0x40e   : > { %v2534_v22 = vsel %vm1786_vm9, %v4022_v9, %v2532_v20  ;;  %v2540_v5 = vsel %vm1786_vm9, %v2532_v20, 0.0  ;;  %v2545_v9 = vmul.f32 %v2541_v47, %v3586_v30 }
 0x40f   : > { %v2543_v54 = vmul.f32 %v2534_v22, %v3551_v63  ;;  %v2544_v57 = vmul.f32 %v2540_v5, %v3645_v8  ;;  %v2670_v23 = vpop.permute.xlu0 %2669  ;;  %2960 = vmatmul.mubr.msk.bf16.vlgmr.msra.gmra.mxu0 %vm1250_vm10, %v2358_v41  ;;  %2496 = vmatprep.subr.bf16.mxu0 %v2478_v50 }
 0x410   : > { %2497 = vmatpush1.bf16.msra.mxu0 %v2477_v17  ;;  %2514 = vmatprep.mubr.bf16.mxu0 %v4241_v31  ;;  %v2681_v36 = vsel %vm2009_vm12, %v2670_v23, 0.0 }
 0x411   : > { %v2547_v32 = vmul.f32 %v2543_v54, %v3586_v30  ;;  %v2548_v24 = vmul.f32 %v2544_v57, %v3527_v51  ;;  %v2605_v28 = vpop.permute.xlu1 %2604  ;;  %2961 = vmatmul.mubr.msk.bf16.vlgmr.msra.gmra.mxu1 %vm1250_vm10, %v2407_v0  ;;  %v2476_v51 = vld [vmem:[%s4192_s17 + $0x14] sm:$0xf]  ;;  %v2684_v49 = vmul.f32 %v2681_v36, %v3645_v8 }
 0x412   : > { %v2607_v34 = vsel %vm1907_vm13, %v4060_v10, %v2605_v28  ;;  %v2613_v27 = vsel %vm1907_vm13, %v2605_v28, 0.0  ;;  %2587 = vmatprep.mubr.bf16.mxu1 %v4241_v31 }
 0x413   : > { %v2550_v52 = vpack.c.bf16 %v2547_v32, %v2545_v9  ;;  %v2617_v30 = vmul.f32 %v2613_v27, %v3645_v8  ;;  %v2599_v58 = vpop.permute.xlu0 %2598  ;;  %v2551_v40 = vpack.c.bf16 %v2548_v24, %v2546_v42  ;;  %v2616_v10 = vmul.f32 %v2607_v34, %v3551_v63 }
 0x414   : > { %v2606_v4 = vsel %vm1907_vm13, %v2599_v58, %v2601_v39  ;;  %v2688_v44 = vmul.f32 %v2684_v49, %v3541_v59 }
 0x415   : > { %v2614_v21 = vmul.f32 %v2606_v4, %v3551_v63  ;;  %v2674_v6 = vpop.permute.xlu1 %2673  ;;  %v2620_v55 = vpack.c.bf16 %v2617_v30, %v2615_v1  ;;  %2569 = vmatprep.subr.bf16.mxu1 %v2551_v40 }
 0x416   : > { %v2682_v60 = vsel %vm2009_vm12, %v2674_v6, 0.0  ;;  %2570 = vmatpush1.bf16.msra.mxu1 %v2550_v52 }
 0x417   : > { %v2619_v62 = vpack.c.bf16 %v2616_v10, %v2614_v21  ;;  %v2686_v15 = vmul.f32 %v2682_v60, %v3645_v8  ;;  %v2668_v3 = vpop.permute.xlu0 %2667  ;;  %2962 = vmatmul.mubr.msk.bf16.vlgmr.msra.gmra.mxu0 %vm1250_vm10, %v2476_v51  ;;  %2638 = vmatprep.subr.bf16.mxu0 %v2620_v55 }
 0x418   : > { %v2675_v11 = vsel %vm2009_vm12, %v2668_v3, %v2670_v23  ;;  %2656 = vmatprep.mubr.bf16.mxu0 %v4241_v31 }
 0x419   : > { %v2690_v2 = vmul.f32 %v2686_v15, %v3541_v59  ;;  %v2683_v19 = vmul.f32 %v2675_v11, %v3551_v63  ;;  %2639 = vmatpush1.bf16.msra.mxu0 %v2619_v62  ;;  %v2672_v8 = vpop.permute.xlu1 %2671  ;;  %2963 = vmatmul.mubr.msk.bf16.vlgmr.msra.gmra.mxu1 %vm1250_vm10, %v2549_v35 }
 0x41a   : > { %v2676_v43 = vsel %vm2009_vm12, %v2672_v8, %v2674_v6  ;;  %2729 = vmatprep.mubr.bf16.mxu1 %v4241_v31 }
 0x41b   : > { %v2685_v33 = vmul.f32 %v2676_v43, %v3551_v63  ;;  %v2693_v38 = vpack.c.bf16 %v2690_v2, %v2688_v44  ;;  %v2687_v29 = vmul.f32 %v2683_v19, %v3533_v56  ;;  %v2691_v63 = vld [vmem:[%s4192_s17 + $0x20] sm:$0xf] }
 0x41d   : > { %v2689_v59 = vmul.f32 %v2685_v33, %v3533_v56  ;;  %2711 = vmatprep.subr.bf16.mxu1 %v2693_v38 }
 0x41f   : > { %v2692_v48 = vpack.c.bf16 %v2689_v59, %v2687_v29  ;;  %2964 = vmatmul.mubr.msk.bf16.vlgmr.msra.gmra.mxu0 %vm1250_vm10, %v2618_v25  ;;  %v2750_v29 = vld [vmem:[%s4194_s19] sm:$0xf] }
 0x420   : > { %2802 = vmatprep.mubr.bf16.mxu0 %v4241_v31 }
 0x421   : > { %2712 = vmatpush1.bf16.msra.mxu1 %v2692_v48 }
 0x424   : > { %2965 = vmatmul.mubr.msk.bf16.vlgmr.msra.gmra.mxu1 %vm1250_vm10, %v2691_v63  ;;  %v2744_v15 = vpop.permute.xlu0 %2743 }
 0x426   : > { %v2757_v59 = vpop.permute.xlu1 %2756 }
 0x4bf   : > { %v2214_v37 = vpop.f32.mrf.mxu1 }
 0x4c1   : > { %v2216_v14 = vpop.f32.mrf.mxu1 }
 0x4c3   : > { %v2218_v53 = vpop.f32.mrf.mxu1 }
 0x4c5   : > { %v2219_v18 = vpop.f32.mrf.mxu1  ;;  %v2258_v7 = vpop.f32.mrf.mxu0 }
 0x4c6   : > { %v2259_v17 = vadd.f32 %v2258_v7, %v2214_v37 }
 0x4c7   : > { %v2260_v13 = vpop.f32.mrf.mxu0 }
 0x4c8   : > { %v2261_v26 = vadd.f32 %v2260_v13, %v2216_v14 }
 0x4c9   : > { %v2262_v56 = vpop.f32.mrf.mxu0  ;;  %v2329_v61 = vpop.f32.mrf.mxu1 }
 0x4ca   : > { %v2336_v22 = vadd.f32 %v2329_v61, %v2259_v17 }
 0x4cb   : > { %v2263_v16 = vpop.f32.mrf.mxu0  ;;  %v2331_v12 = vpop.f32.mrf.mxu1 }
 0x4cc   : > { %v2337_v54 = vadd.f32 %v2331_v12, %v2261_v26 }
 0x4cd   : > { %v2333_v46 = vpop.f32.mrf.mxu1 }
 0x4cf   : > { %v2334_v39 = vpop.f32.mrf.mxu1  ;;  %v2398_v31 = vpop.f32.mrf.mxu0 }
 0x4d0   : > { %v2405_v57 = vadd.f32 %v2398_v31, %v2336_v22 }
 0x4d1   : > { %v2400_v41 = vpop.f32.mrf.mxu0  ;;  %v2447_v47 = vpop.f32.mrf.mxu1 }
 0x4d2   : > { %v2406_v9 = vadd.f32 %v2400_v41, %v2337_v54  ;;  %v2454_v28 = vadd.f32 %v2447_v47, %v2405_v57 }
 0x4d3   : > { %v2402_v20 = vpop.f32.mrf.mxu0  ;;  %v2449_v50 = vpop.f32.mrf.mxu1 }
 0x4d4   : > { %v2455_v34 = vadd.f32 %v2449_v50, %v2406_v9 }
 0x4d5   : > { %v2403_v5 = vpop.f32.mrf.mxu0  ;;  %v2451_v0 = vpop.f32.mrf.mxu1 }
 0x4d7   : > { %v2452_v23 = vpop.f32.mrf.mxu1  ;;  %v2516_v45 = vpop.f32.mrf.mxu0 }
 0x4d8   : > { %v2523_v27 = vadd.f32 %v2516_v45, %v2454_v28 }
 0x4d9   : > { %v2518_v32 = vpop.f32.mrf.mxu0  ;;  %v2589_v24 = vpop.f32.mrf.mxu1 }
 0x4da   : > { %v2524_v30 = vadd.f32 %v2518_v32, %v2455_v34  ;;  %v2596_v40 = vadd.f32 %v2589_v24, %v2523_v27 }
 0x4db   : > { %v2520_v42 = vpop.f32.mrf.mxu0  ;;  %v2591_v36 = vpop.f32.mrf.mxu1 }
 0x4dc   : > { %v2597_v49 = vadd.f32 %v2591_v36, %v2524_v30 }
 0x4dd   : > { %v2521_v1 = vpop.f32.mrf.mxu0  ;;  %v2593_v52 = vpop.f32.mrf.mxu1 }
 0x4df   : > { %v2658_v58 = vpop.f32.mrf.mxu0  ;;  %v2594_v4 = vpop.f32.mrf.mxu1 }
 0x4e0   : > { %v2665_v10 = vadd.f32 %v2658_v58, %v2596_v40 }
 0x4e1   : > { %v2660_v51 = vpop.f32.mrf.mxu0 }
 0x4e2   : > { %v2666_v55 = vadd.f32 %v2660_v51, %v2597_v49 }
 0x4e3   : > { %v2662_v21 = vpop.f32.mrf.mxu0 }
 0x4e4   : > { %v2731_v6 = vpop.f32.mrf.mxu1 }
 0x4e5   : > { %v2738_v60 = vadd.f32 %v2731_v6, %v2665_v10  ;;  %v2663_v62 = vpop.f32.mrf.mxu0 }
 0x4e6   : > { %v2733_v3 = vpop.f32.mrf.mxu1 }
 0x4e7   : > { %v2746_v35 = vadd.f32 %v2744_v15, %v2738_v60  ;;  %v2739_v11 = vadd.f32 %v2733_v3, %v2666_v55 }
 0x4e8   : > { %v2735_v44 = vpop.f32.mrf.mxu1 }
 0x4e9   : > { %v2748_v2 = vmax.f32 %v2746_v35, 0.0  ;;  %v2747_v19 = vadd.f32 %v2744_v15, %v2739_v11 }
 0x4ea   : > { %v2736_v8 = vpop.f32.mrf.mxu1 }
 0x4eb   : > { %v2751_v43 = vpack.c.bf16 %v2748_v2, %v2748_v2  ;;  %v2749_v33 = vmax.f32 %v2747_v19, 0.0 }
 0x4ed   : > { %v2752_v38 = vpack.c.bf16 %v2749_v33, %v2749_v33  ;;  %v2765_v25 = vsel %vm2763_vm14, %v2751_v43, 0 }
 0x4ef   : > { %2966 = vmatprep.subr.msk.bf16.mxu0 %vm2763_vm14, %v2752_v38 }
 0x4f0   : > { %2785 = vmatpush1.bf16.msra.mxu0 %v2765_v25 }
 0x4f3   : > { %2967 = vmatmul.mubr.msk.bf16.vlgmr.msra.gmra.mxu0 %vm2759_vm15, %v2750_v29 }
 0x5b3   : > { %v2804_v48 = vpop.f32.mrf.mxu0 }
 0x5b4   : > { %v2805_v63 = vadd.f32 %v2804_v48, %v2757_v59 }
 0x5b5   : > { %v2806_v37 = vpop.f32.mrf.mxu0 }
 0x5b6   : > { %2811 = vst [vmem:[%s696_s23] sm:$0xff] %v2805_v63  ;;  %v2807_v14 = vadd.f32 %v2806_v37, %v2757_v59 }
 0x5b7   : > { %v2808_v53 = vpop.f32.mrf.mxu0 }
 0x5b8   : > { %2812 = vst [vmem:[%s696_s23 + $0x8] sm:$0xff] %v2807_v14 }
 0x5b9   : > { %v2809_v18 = vpop.f32.mrf.mxu0 }
 0x5ba PF: > { %s4260_s1 = sld [smem:[#allocation2_spill]] }
 0x5c0   : > { %s31_s2 = sadd.s32 1, %s4260_s1  }
 0x5c1   : > { %p28_p4 = scmp.ge.s32.totalorder %s31_s2, 4  }
 0x5c3   :  { %30 = sbr.rel (!%p28_p4) target bundleno = 10 (0xa), region = 140 }

</bundles_post_ra>
